<compile_context>
chip_gen: v7x
topology: tpu7x:2x2x1
jax: 0.10.0
libtpu: 0.0.40
codegen_flags: <defaults>
</compile_context>

<pallas_src>
import math

import jax
import jax.numpy as jnp
from jax.experimental import pallas as pl

# ----------------------------- tiny BERT config -----------------------------
VOCAB = 100
TYPE_VOCAB = 2
MAX_POS = 64
HIDDEN = 32
HEADS = 2
HEAD_DIM = HIDDEN // HEADS
LAYERS = 2
INTERMEDIATE = 64
NUM_CLASSES = 3
EPS = 1e-12          # BERT LayerNorm eps
CLS_PAD = 128        # lane-dense classifier output width (sliced to NUM_CLASSES outside)


# ------------------------------ in-kernel helpers ----------------------------
def _ln(x, g, b):
    mean = jnp.mean(x, axis=-1, keepdims=True)
    var = jnp.mean(jnp.square(x - mean), axis=-1, keepdims=True)
    return (x - mean) * jax.lax.rsqrt(var + EPS) * g + b


# ------------------------------- fused kernel --------------------------------
def _make_bert_kernel(B, S):
    """Whole BERT-for-classification forward, VMEM/vreg resident."""
    scale = 1.0 / math.sqrt(HEAD_DIM)

    def kernel(emb_ref, bias_ref, eg_ref, eb_ref,
               qkv_w_ref, qkv_b_ref, o_w_ref, o_b_ref,
               ln1_g_ref, ln1_b_ref, i_w_ref, i_b_ref,
               ff_w_ref, ff_b_ref, ln2_g_ref, ln2_b_ref,
               pw_ref, pb_ref, cw_ref, cb_ref, out_ref):
        # Embedding LayerNorm (fused; no standalone launch / HBM round-trip).
        h = _ln(emb_ref[...].astype(jnp.float32), eg_ref[...], eb_ref[...])  # (B*S, H)

        # Encoder layers: static unroll; weights indexed off the stacked LAYERS axis.
        for li in range(LAYERS):
            # Fused Q/K/V projection on the flattened batch: (B*S, H) @ (H, 3H).
            qkv = (jnp.dot(h, qkv_w_ref[li], preferred_element_type=jnp.float32)
                   + qkv_b_ref[li])

            # Multi-head attention; all intermediates stay in vregs (no VMEM
            # scratch, no masked partial stores).
            # TODO(synk): at real BERT sizes (HIDDEN=768, 12 heads, S=512) switch
            # the static per-(batch, head) loop to a head-batched dot_general and
            # a tiled grid with a f32 VMEM accumulator (bf16 weights on v7x).
            ctx_rows = []
            for b in range(B):
                r0 = b * S
                bias_b = bias_ref[b]                                   # (1, S)
                head_ctx = []
                for hd in range(HEADS):
                    lo = hd * HEAD_DIM
                    q_h = qkv[r0:r0 + S, lo:lo + HEAD_DIM]
                    k_h = qkv[r0:r0 + S, HIDDEN + lo:HIDDEN + lo + HEAD_DIM]
                    v_h = qkv[r0:r0 + S, 2 * HIDDEN + lo:2 * HIDDEN + lo + HEAD_DIM]
                    s = jax.lax.dot_general(q_h, k_h, (((1,), (1,)), ((), ())),
                                            preferred_element_type=jnp.float32)
                    s = s * scale + bias_b                             # (S, S)
                    m = jnp.max(s, axis=-1, keepdims=True)
                    p = jnp.exp(s - m)
                    # Softmax denominator via EUP reciprocal (frees VALU slots).
                    p = p * pl.reciprocal(jnp.sum(p, axis=-1, keepdims=True),
                                          approx=True)
                    head_ctx.append(jnp.dot(p, v_h,
                                            preferred_element_type=jnp.float32))
                # Heads re-joined on the lane axis, in registers.
                ctx_rows.append(jnp.concatenate(head_ctx, axis=-1))    # (S, H)
            ctx = jnp.concatenate(ctx_rows, axis=0)                    # (B*S, H)

            # Attention output projection + residual + LayerNorm.
            attn_out = (jnp.dot(ctx, o_w_ref[li], preferred_element_type=jnp.float32)
                        + o_b_ref[li])
            h = _ln(h + attn_out, ln1_g_ref[li], ln1_b_ref[li])

            # Feed-forward (GELU) + residual + LayerNorm.
            inter = (jnp.dot(h, i_w_ref[li], preferred_element_type=jnp.float32)
                     + i_b_ref[li])
            # TODO(synk): HF BERT uses erf-GELU; tanh-approx GELU used here (Mosaic-safe).
            inter = jax.nn.gelu(inter, approximate=True)
            ffn = (jnp.dot(inter, ff_w_ref[li], preferred_element_type=jnp.float32)
                   + ff_b_ref[li])
            h = _ln(h + ffn, ln2_g_ref[li], ln2_b_ref[li])

        # Pooler (tanh on the [CLS] row of each sequence) + dropout(identity)
        # + classifier; output is a lane-dense 128-wide slab.
        cls = jnp.concatenate([h[b * S:b * S + 1, :] for b in range(B)], axis=0)  # (B, H)
        pooled = jnp.tanh(jnp.dot(cls, pw_ref[...],
                                  preferred_element_type=jnp.float32) + pb_ref[...])
        logits = jnp.dot(pooled, cw_ref[...],
                         preferred_element_type=jnp.float32) + cb_ref[...]
        out_ref[...] = logits.astype(out_ref.dtype)

    return kernel


def _full_spec(a):
    """Whole-array block (no grid): block_shape == array shape, zero offset."""
    zeros = (0,) * a.ndim
    return pl.BlockSpec(a.shape, lambda: zeros)


# ------------------------- deterministic parameters --------------------------
def init_params(key):
    def nrm(k, shape):
        return (0.02 * jax.random.normal(k, shape)).astype(jnp.float32)

    keys = jax.random.split(key, 8 + LAYERS)

    cls_w = nrm(keys[4], (HIDDEN, NUM_CLASSES))
    cls_b = jnp.zeros((NUM_CLASSES,), jnp.float32)

    p = {
        "word_emb": nrm(keys[0], (VOCAB, HIDDEN)),
        "pos_emb": nrm(keys[1], (MAX_POS, HIDDEN)),
        "type_emb": nrm(keys[2], (TYPE_VOCAB, HIDDEN)),
        "emb_ln_g": jnp.ones((1, HIDDEN), jnp.float32),
        "emb_ln_b": jnp.zeros((1, HIDDEN), jnp.float32),
        "pool_w": nrm(keys[3], (HIDDEN, HIDDEN)),
        "pool_b": jnp.zeros((1, HIDDEN), jnp.float32),
        # Classifier padded once here to a lane-dense 128-wide output.
        "cls_w_p": jnp.pad(cls_w, ((0, 0), (0, CLS_PAD - NUM_CLASSES))),
        "cls_b_p": jnp.pad(cls_b.reshape(1, -1), ((0, 0), (0, CLS_PAD - NUM_CLASSES))),
    }

    # Per-layer weights, stacked on a leading LAYERS axis for the fused kernel.
    qkv_w, qkv_b, o_w, o_b = [], [], [], []
    ln1_g, ln1_b, i_w, i_b, ff_w, ff_b, ln2_g, ln2_b = [], [], [], [], [], [], [], []
    for li in range(LAYERS):
        lk = jax.random.split(keys[8 + li], 6)
        # Q/K/V fused into a single (HIDDEN, 3*HIDDEN) projection (columns Q|K|V).
        qkv_w.append(jnp.concatenate(
            [nrm(lk[0], (HIDDEN, HIDDEN)),
             nrm(lk[1], (HIDDEN, HIDDEN)),
             nrm(lk[2], (HIDDEN, HIDDEN))], axis=1))
        qkv_b.append(jnp.zeros((1, 3 * HIDDEN), jnp.float32))
        o_w.append(nrm(lk[3], (HIDDEN, HIDDEN)))
        o_b.append(jnp.zeros((1, HIDDEN), jnp.float32))
        ln1_g.append(jnp.ones((1, HIDDEN), jnp.float32))
        ln1_b.append(jnp.zeros((1, HIDDEN), jnp.float32))
        i_w.append(nrm(lk[4], (HIDDEN, INTERMEDIATE)))
        i_b.append(jnp.zeros((1, INTERMEDIATE), jnp.float32))
        ff_w.append(nrm(lk[5], (INTERMEDIATE, HIDDEN)))
        ff_b.append(jnp.zeros((1, HIDDEN), jnp.float32))
        ln2_g.append(jnp.ones((1, HIDDEN), jnp.float32))
        ln2_b.append(jnp.zeros((1, HIDDEN), jnp.float32))

    p.update({
        "qkv_w": jnp.stack(qkv_w), "qkv_b": jnp.stack(qkv_b),
        "o_w": jnp.stack(o_w), "o_b": jnp.stack(o_b),
        "attn_ln_g": jnp.stack(ln1_g), "attn_ln_b": jnp.stack(ln1_b),
        "i_w": jnp.stack(i_w), "i_b": jnp.stack(i_b),
        "ff_w": jnp.stack(ff_w), "ff_b": jnp.stack(ff_b),
        "out_ln_g": jnp.stack(ln2_g), "out_ln_b": jnp.stack(ln2_b),
    })
    return p


# ----------------------------- model forward pass ----------------------------
def bert_for_classification(params, input_ids, attention_mask, token_type_ids):
    B, S = input_ids.shape

    # Embedding-table gathers are plain-JAX glue (no clean Pallas equivalent).
    pos_ids = jnp.arange(S, dtype=jnp.int32)[None, :]
    emb = (params["word_emb"][input_ids]
           + params["pos_emb"][pos_ids]
           + params["type_emb"][token_type_ids])           # (B, S, H)
    emb = emb.reshape(B * S, HIDDEN)

    # Additive attention mask: (1 - mask) * -10000, shape (B, 1, S).
    bias = ((1.0 - attention_mask.astype(jnp.float32)) * -10000.0)[:, None, :]

    args = (emb, bias,
            params["emb_ln_g"], params["emb_ln_b"],
            params["qkv_w"], params["qkv_b"],
            params["o_w"], params["o_b"],
            params["attn_ln_g"], params["attn_ln_b"],
            params["i_w"], params["i_b"],
            params["ff_w"], params["ff_b"],
            params["out_ln_g"], params["out_ln_b"],
            params["pool_w"], params["pool_b"],
            params["cls_w_p"], params["cls_b_p"])

    logits_p = pl.pallas_call(
        _make_bert_kernel(B, S),
        out_shape=jax.ShapeDtypeStruct((B, CLS_PAD), jnp.float32),
        in_specs=[_full_spec(a) for a in args],
        out_specs=pl.BlockSpec((B, CLS_PAD), lambda: (0, 0)),
    )(*args)

    return logits_p[:, :NUM_CLASSES]


# ----------------------------------- main ------------------------------------
if __name__ == "__main__":
    key = jax.random.PRNGKey(0)
    k_param, k_ids, k_type = jax.random.split(key, 3)

    B, S = 2, 8
    params = init_params(k_param)

    input_ids = jax.random.randint(k_ids, (B, S), 0, VOCAB, dtype=jnp.int32)
    attention_mask = jnp.array([[1, 1, 1, 1, 1, 1, 1, 1],
                                [1, 1, 1, 1, 1, 0, 0, 0]], dtype=jnp.int32)
    token_type_ids = jax.random.randint(k_type, (B, S), 0, TYPE_VOCAB, dtype=jnp.int32)

    fwd = jax.jit(bert_for_classification)
    logits = fwd(params, input_ids, attention_mask, token_type_ids)
    jax.block_until_ready(logits)

    assert logits.shape == (B, NUM_CLASSES)
    print("KERNEL_OK")
</pallas_src>

<mosaic_0001>
module attributes {stable_mosaic.version = 11 : i64} {
  func.func @kernel(%arg0: memref<16x32xf32, #tpu.memory_space<vmem>>, %arg1: memref<2x1x8xf32, #tpu.memory_space<vmem>>, %arg2: memref<1x32xf32, #tpu.memory_space<vmem>>, %arg3: memref<1x32xf32, #tpu.memory_space<vmem>>, %arg4: memref<2x32x96xf32, #tpu.memory_space<vmem>>, %arg5: memref<2x1x96xf32, #tpu.memory_space<vmem>>, %arg6: memref<2x32x32xf32, #tpu.memory_space<vmem>>, %arg7: memref<2x1x32xf32, #tpu.memory_space<vmem>>, %arg8: memref<2x1x32xf32, #tpu.memory_space<vmem>>, %arg9: memref<2x1x32xf32, #tpu.memory_space<vmem>>, %arg10: memref<2x32x64xf32, #tpu.memory_space<vmem>>, %arg11: memref<2x1x64xf32, #tpu.memory_space<vmem>>, %arg12: memref<2x64x32xf32, #tpu.memory_space<vmem>>, %arg13: memref<2x1x32xf32, #tpu.memory_space<vmem>>, %arg14: memref<2x1x32xf32, #tpu.memory_space<vmem>>, %arg15: memref<2x1x32xf32, #tpu.memory_space<vmem>>, %arg16: memref<32x32xf32, #tpu.memory_space<vmem>>, %arg17: memref<1x32xf32, #tpu.memory_space<vmem>>, %arg18: memref<32x128xf32, #tpu.memory_space<vmem>>, %arg19: memref<1x128xf32, #tpu.memory_space<vmem>>, %arg20: memref<2x128xf32, #tpu.memory_space<vmem>>) attributes {dimension_semantics = [], scalar_prefetch = 0 : i64, scratch_operands = 0 : i64, tpu.core_type = #tpu.core_type<tc>} {
    %c0 = arith.constant 0 : index
    %c0_0 = arith.constant 0 : index
    %0 = vector.load %arg0[%c0, %c0_0] : memref<16x32xf32, #tpu.memory_space<vmem>>, vector<16x32xf32>
    %c0_1 = arith.constant 0 : index
    %c0_2 = arith.constant 0 : index
    %1 = vector.load %arg2[%c0_1, %c0_2] : memref<1x32xf32, #tpu.memory_space<vmem>>, vector<1x32xf32>
    %c0_3 = arith.constant 0 : index
    %c0_4 = arith.constant 0 : index
    %2 = vector.load %arg3[%c0_3, %c0_4] : memref<1x32xf32, #tpu.memory_space<vmem>>, vector<1x32xf32>
    %cst = arith.constant dense<0.000000e+00> : vector<16xf32>
    %3 = vector.multi_reduction <add>, %0, %cst [1] : vector<16x32xf32> to vector<16xf32>
    %4 = vector.shape_cast %3 : vector<16xf32> to vector<16x1xf32>
    %cst_5 = arith.constant 3.200000e+01 : f32
    %5 = vector.broadcast %cst_5 : f32 to vector<16x1xf32>
    %6 = arith.divf %4, %5 : vector<16x1xf32>
    %7 = vector.broadcast %6 : vector<16x1xf32> to vector<16x32xf32>
    %8 = arith.subf %0, %7 : vector<16x32xf32>
    %9 = arith.mulf %8, %8 : vector<16x32xf32>
    %cst_6 = arith.constant dense<0.000000e+00> : vector<16xf32>
    %10 = vector.multi_reduction <add>, %9, %cst_6 [1] : vector<16x32xf32> to vector<16xf32>
    %11 = vector.shape_cast %10 : vector<16xf32> to vector<16x1xf32>
    %cst_7 = arith.constant 3.200000e+01 : f32
    %12 = vector.broadcast %cst_7 : f32 to vector<16x1xf32>
    %13 = arith.divf %11, %12 : vector<16x1xf32>
    %14 = vector.broadcast %6 : vector<16x1xf32> to vector<16x32xf32>
    %15 = arith.subf %0, %14 : vector<16x32xf32>
    %cst_8 = arith.constant 9.99999996E-13 : f32
    %16 = vector.broadcast %cst_8 : f32 to vector<16x1xf32>
    %17 = arith.addf %13, %16 : vector<16x1xf32>
    %18 = math.rsqrt %17 : vector<16x1xf32>
    %19 = vector.broadcast %18 : vector<16x1xf32> to vector<16x32xf32>
    %20 = arith.mulf %15, %19 : vector<16x32xf32>
    %21 = vector.broadcast %1 : vector<1x32xf32> to vector<16x32xf32>
    %22 = arith.mulf %20, %21 : vector<16x32xf32>
    %23 = vector.broadcast %2 : vector<1x32xf32> to vector<16x32xf32>
    %24 = arith.addf %22, %23 : vector<16x32xf32>
    %c0_9 = arith.constant 0 : index
    %c0_10 = arith.constant 0 : index
    %c0_11 = arith.constant 0 : index
    %25 = vector.load %arg4[%c0_9, %c0_10, %c0_11] : memref<2x32x96xf32, #tpu.memory_space<vmem>>, vector<1x32x96xf32>
    %26 = vector.shape_cast %25 : vector<1x32x96xf32> to vector<32x96xf32>
    %cst_12 = arith.constant dense<0.000000e+00> : vector<16x96xf32>
    %27 = tpu.matmul %24, %26, %cst_12 {dimension_numbers = #tpu.dot_dimension_numbers<[1], [0], [0], [1], [0, 0, 1, 1], [], []>} : vector<16x32xf32>, vector<32x96xf32>, vector<16x96xf32> -> vector<16x96xf32>
    %c0_13 = arith.constant 0 : index
    %c0_14 = arith.constant 0 : index
    %c0_15 = arith.constant 0 : index
    %28 = vector.load %arg5[%c0_13, %c0_14, %c0_15] : memref<2x1x96xf32, #tpu.memory_space<vmem>>, vector<1x1x96xf32>
    %29 = vector.shape_cast %28 : vector<1x1x96xf32> to vector<1x96xf32>
    %30 = vector.broadcast %29 : vector<1x96xf32> to vector<16x96xf32>
    %31 = arith.addf %27, %30 : vector<16x96xf32>
    %c0_16 = arith.constant 0 : index
    %c0_17 = arith.constant 0 : index
    %c0_18 = arith.constant 0 : index
    %32 = vector.load %arg1[%c0_16, %c0_17, %c0_18] : memref<2x1x8xf32, #tpu.memory_space<vmem>>, vector<1x1x8xf32>
    %33 = vector.shape_cast %32 : vector<1x1x8xf32> to vector<1x8xf32>
    %34 = vector.extract_strided_slice %31 {offsets = [0, 0], sizes = [8, 16], strides = [1, 1]} : vector<16x96xf32> to vector<8x16xf32>
    %35 = vector.extract_strided_slice %31 {offsets = [0, 32], sizes = [8, 16], strides = [1, 1]} : vector<16x96xf32> to vector<8x16xf32>
    %36 = vector.extract_strided_slice %31 {offsets = [0, 64], sizes = [8, 16], strides = [1, 1]} : vector<16x96xf32> to vector<8x16xf32>
    %cst_19 = arith.constant dense<0.000000e+00> : vector<8x8xf32>
    %37 = tpu.matmul %34, %35, %cst_19 {dimension_numbers = #tpu.dot_dimension_numbers<[1], [1], [0], [0], [0, 0, 1, 0], [], []>} : vector<8x16xf32>, vector<8x16xf32>, vector<8x8xf32> -> vector<8x8xf32>
    %cst_20 = arith.constant 2.500000e-01 : f32
    %38 = vector.broadcast %cst_20 : f32 to vector<8x8xf32>
    %39 = arith.mulf %37, %38 : vector<8x8xf32>
    %40 = vector.broadcast %33 : vector<1x8xf32> to vector<8x8xf32>
    %41 = arith.addf %39, %40 : vector<8x8xf32>
    %cst_21 = arith.constant dense<0xFF800000> : vector<8xf32>
    %42 = vector.multi_reduction <maximumf>, %41, %cst_21 [1] : vector<8x8xf32> to vector<8xf32>
    %43 = vector.shape_cast %42 : vector<8xf32> to vector<8x1xf32>
    %44 = vector.broadcast %43 : vector<8x1xf32> to vector<8x8xf32>
    %45 = arith.subf %41, %44 : vector<8x8xf32>
    %46 = math.exp %45 : vector<8x8xf32>
    %cst_22 = arith.constant dense<0.000000e+00> : vector<8xf32>
    %47 = vector.multi_reduction <add>, %46, %cst_22 [1] : vector<8x8xf32> to vector<8xf32>
    %48 = vector.shape_cast %47 : vector<8xf32> to vector<8x1xf32>
    %49 = tpu.reciprocal %48 {approx = true} : vector<8x1xf32> -> vector<8x1xf32>
    %50 = vector.broadcast %49 : vector<8x1xf32> to vector<8x8xf32>
    %51 = arith.mulf %46, %50 : vector<8x8xf32>
    %cst_23 = arith.constant dense<0.000000e+00> : vector<8x16xf32>
    %52 = tpu.matmul %51, %36, %cst_23 {dimension_numbers = #tpu.dot_dimension_numbers<[1], [0], [0], [1], [0, 0, 1, 1], [], []>} : vector<8x8xf32>, vector<8x16xf32>, vector<8x16xf32> -> vector<8x16xf32>
    %53 = vector.extract_strided_slice %31 {offsets = [0, 16], sizes = [8, 16], strides = [1, 1]} : vector<16x96xf32> to vector<8x16xf32>
    %54 = vector.extract_strided_slice %31 {offsets = [0, 48], sizes = [8, 16], strides = [1, 1]} : vector<16x96xf32> to vector<8x16xf32>
    %55 = vector.extract_strided_slice %31 {offsets = [0, 80], sizes = [8, 16], strides = [1, 1]} : vector<16x96xf32> to vector<8x16xf32>
    %cst_24 = arith.constant dense<0.000000e+00> : vector<8x8xf32>
    %56 = tpu.matmul %53, %54, %cst_24 {dimension_numbers = #tpu.dot_dimension_numbers<[1], [1], [0], [0], [0, 0, 1, 0], [], []>} : vector<8x16xf32>, vector<8x16xf32>, vector<8x8xf32> -> vector<8x8xf32>
    %cst_25 = arith.constant 2.500000e-01 : f32
    %57 = vector.broadcast %cst_25 : f32 to vector<8x8xf32>
    %58 = arith.mulf %56, %57 : vector<8x8xf32>
    %59 = vector.broadcast %33 : vector<1x8xf32> to vector<8x8xf32>
    %60 = arith.addf %58, %59 : vector<8x8xf32>
    %cst_26 = arith.constant dense<0xFF800000> : vector<8xf32>
    %61 = vector.multi_reduction <maximumf>, %60, %cst_26 [1] : vector<8x8xf32> to vector<8xf32>
    %62 = vector.shape_cast %61 : vector<8xf32> to vector<8x1xf32>
    %63 = vector.broadcast %62 : vector<8x1xf32> to vector<8x8xf32>
    %64 = arith.subf %60, %63 : vector<8x8xf32>
    %65 = math.exp %64 : vector<8x8xf32>
    %cst_27 = arith.constant dense<0.000000e+00> : vector<8xf32>
    %66 = vector.multi_reduction <add>, %65, %cst_27 [1] : vector<8x8xf32> to vector<8xf32>
    %67 = vector.shape_cast %66 : vector<8xf32> to vector<8x1xf32>
    %68 = tpu.reciprocal %67 {approx = true} : vector<8x1xf32> -> vector<8x1xf32>
    %69 = vector.broadcast %68 : vector<8x1xf32> to vector<8x8xf32>
    %70 = arith.mulf %65, %69 : vector<8x8xf32>
    %cst_28 = arith.constant dense<0.000000e+00> : vector<8x16xf32>
    %71 = tpu.matmul %70, %55, %cst_28 {dimension_numbers = #tpu.dot_dimension_numbers<[1], [0], [0], [1], [0, 0, 1, 1], [], []>} : vector<8x8xf32>, vector<8x16xf32>, vector<8x16xf32> -> vector<8x16xf32>
    %72 = tpu.concatenate %52, %71 in 1 : vector<8x16xf32>, vector<8x16xf32> -> vector<8x32xf32>
    %c1 = arith.constant 1 : index
    %c0_29 = arith.constant 0 : index
    %c0_30 = arith.constant 0 : index
    %73 = vector.load %arg1[%c1, %c0_29, %c0_30] : memref<2x1x8xf32, #tpu.memory_space<vmem>>, vector<1x1x8xf32>
    %74 = vector.shape_cast %73 : vector<1x1x8xf32> to vector<1x8xf32>
    %75 = vector.extract_strided_slice %31 {offsets = [8, 0], sizes = [8, 16], strides = [1, 1]} : vector<16x96xf32> to vector<8x16xf32>
    %76 = vector.extract_strided_slice %31 {offsets = [8, 32], sizes = [8, 16], strides = [1, 1]} : vector<16x96xf32> to vector<8x16xf32>
    %77 = vector.extract_strided_slice %31 {offsets = [8, 64], sizes = [8, 16], strides = [1, 1]} : vector<16x96xf32> to vector<8x16xf32>
    %cst_31 = arith.constant dense<0.000000e+00> : vector<8x8xf32>
    %78 = tpu.matmul %75, %76, %cst_31 {dimension_numbers = #tpu.dot_dimension_numbers<[1], [1], [0], [0], [0, 0, 1, 0], [], []>} : vector<8x16xf32>, vector<8x16xf32>, vector<8x8xf32> -> vector<8x8xf32>
    %cst_32 = arith.constant 2.500000e-01 : f32
    %79 = vector.broadcast %cst_32 : f32 to vector<8x8xf32>
    %80 = arith.mulf %78, %79 : vector<8x8xf32>
    %81 = vector.broadcast %74 : vector<1x8xf32> to vector<8x8xf32>
    %82 = arith.addf %80, %81 : vector<8x8xf32>
    %cst_33 = arith.constant dense<0xFF800000> : vector<8xf32>
    %83 = vector.multi_reduction <maximumf>, %82, %cst_33 [1] : vector<8x8xf32> to vector<8xf32>
    %84 = vector.shape_cast %83 : vector<8xf32> to vector<8x1xf32>
    %85 = vector.broadcast %84 : vector<8x1xf32> to vector<8x8xf32>
    %86 = arith.subf %82, %85 : vector<8x8xf32>
    %87 = math.exp %86 : vector<8x8xf32>
    %cst_34 = arith.constant dense<0.000000e+00> : vector<8xf32>
    %88 = vector.multi_reduction <add>, %87, %cst_34 [1] : vector<8x8xf32> to vector<8xf32>
    %89 = vector.shape_cast %88 : vector<8xf32> to vector<8x1xf32>
    %90 = tpu.reciprocal %89 {approx = true} : vector<8x1xf32> -> vector<8x1xf32>
    %91 = vector.broadcast %90 : vector<8x1xf32> to vector<8x8xf32>
    %92 = arith.mulf %87, %91 : vector<8x8xf32>
    %cst_35 = arith.constant dense<0.000000e+00> : vector<8x16xf32>
    %93 = tpu.matmul %92, %77, %cst_35 {dimension_numbers = #tpu.dot_dimension_numbers<[1], [0], [0], [1], [0, 0, 1, 1], [], []>} : vector<8x8xf32>, vector<8x16xf32>, vector<8x16xf32> -> vector<8x16xf32>
    %94 = vector.extract_strided_slice %31 {offsets = [8, 16], sizes = [8, 16], strides = [1, 1]} : vector<16x96xf32> to vector<8x16xf32>
    %95 = vector.extract_strided_slice %31 {offsets = [8, 48], sizes = [8, 16], strides = [1, 1]} : vector<16x96xf32> to vector<8x16xf32>
    %96 = vector.extract_strided_slice %31 {offsets = [8, 80], sizes = [8, 16], strides = [1, 1]} : vector<16x96xf32> to vector<8x16xf32>
    %cst_36 = arith.constant dense<0.000000e+00> : vector<8x8xf32>
    %97 = tpu.matmul %94, %95, %cst_36 {dimension_numbers = #tpu.dot_dimension_numbers<[1], [1], [0], [0], [0, 0, 1, 0], [], []>} : vector<8x16xf32>, vector<8x16xf32>, vector<8x8xf32> -> vector<8x8xf32>
    %cst_37 = arith.constant 2.500000e-01 : f32
    %98 = vector.broadcast %cst_37 : f32 to vector<8x8xf32>
    %99 = arith.mulf %97, %98 : vector<8x8xf32>
    %100 = vector.broadcast %74 : vector<1x8xf32> to vector<8x8xf32>
    %101 = arith.addf %99, %100 : vector<8x8xf32>
    %cst_38 = arith.constant dense<0xFF800000> : vector<8xf32>
    %102 = vector.multi_reduction <maximumf>, %101, %cst_38 [1] : vector<8x8xf32> to vector<8xf32>
    %103 = vector.shape_cast %102 : vector<8xf32> to vector<8x1xf32>
    %104 = vector.broadcast %103 : vector<8x1xf32> to vector<8x8xf32>
    %105 = arith.subf %101, %104 : vector<8x8xf32>
    %106 = math.exp %105 : vector<8x8xf32>
    %cst_39 = arith.constant dense<0.000000e+00> : vector<8xf32>
    %107 = vector.multi_reduction <add>, %106, %cst_39 [1] : vector<8x8xf32> to vector<8xf32>
    %108 = vector.shape_cast %107 : vector<8xf32> to vector<8x1xf32>
    %109 = tpu.reciprocal %108 {approx = true} : vector<8x1xf32> -> vector<8x1xf32>
    %110 = vector.broadcast %109 : vector<8x1xf32> to vector<8x8xf32>
    %111 = arith.mulf %106, %110 : vector<8x8xf32>
    %cst_40 = arith.constant dense<0.000000e+00> : vector<8x16xf32>
    %112 = tpu.matmul %111, %96, %cst_40 {dimension_numbers = #tpu.dot_dimension_numbers<[1], [0], [0], [1], [0, 0, 1, 1], [], []>} : vector<8x8xf32>, vector<8x16xf32>, vector<8x16xf32> -> vector<8x16xf32>
    %113 = tpu.concatenate %93, %112 in 1 : vector<8x16xf32>, vector<8x16xf32> -> vector<8x32xf32>
    %114 = tpu.concatenate %72, %113 in 0 : vector<8x32xf32>, vector<8x32xf32> -> vector<16x32xf32>
    %c0_41 = arith.constant 0 : index
    %c0_42 = arith.constant 0 : index
    %c0_43 = arith.constant 0 : index
    %115 = vector.load %arg6[%c0_41, %c0_42, %c0_43] : memref<2x32x32xf32, #tpu.memory_space<vmem>>, vector<1x32x32xf32>
    %116 = vector.shape_cast %115 : vector<1x32x32xf32> to vector<32x32xf32>
    %cst_44 = arith.constant dense<0.000000e+00> : vector<16x32xf32>
    %117 = tpu.matmul %114, %116, %cst_44 {dimension_numbers = #tpu.dot_dimension_numbers<[1], [0], [0], [1], [0, 0, 1, 1], [], []>} : vector<16x32xf32>, vector<32x32xf32>, vector<16x32xf32> -> vector<16x32xf32>
    %c0_45 = arith.constant 0 : index
    %c0_46 = arith.constant 0 : index
    %c0_47 = arith.constant 0 : index
    %118 = vector.load %arg7[%c0_45, %c0_46, %c0_47] : memref<2x1x32xf32, #tpu.memory_space<vmem>>, vector<1x1x32xf32>
    %119 = vector.shape_cast %118 : vector<1x1x32xf32> to vector<1x32xf32>
    %120 = vector.broadcast %119 : vector<1x32xf32> to vector<16x32xf32>
    %121 = arith.addf %117, %120 : vector<16x32xf32>
    %122 = arith.addf %24, %121 : vector<16x32xf32>
    %c0_48 = arith.constant 0 : index
    %c0_49 = arith.constant 0 : index
    %c0_50 = arith.constant 0 : index
    %123 = vector.load %arg8[%c0_48, %c0_49, %c0_50] : memref<2x1x32xf32, #tpu.memory_space<vmem>>, vector<1x1x32xf32>
    %124 = vector.shape_cast %123 : vector<1x1x32xf32> to vector<1x32xf32>
    %c0_51 = arith.constant 0 : index
    %c0_52 = arith.constant 0 : index
    %c0_53 = arith.constant 0 : index
    %125 = vector.load %arg9[%c0_51, %c0_52, %c0_53] : memref<2x1x32xf32, #tpu.memory_space<vmem>>, vector<1x1x32xf32>
    %126 = vector.shape_cast %125 : vector<1x1x32xf32> to vector<1x32xf32>
    %cst_54 = arith.constant dense<0.000000e+00> : vector<16xf32>
    %127 = vector.multi_reduction <add>, %122, %cst_54 [1] : vector<16x32xf32> to vector<16xf32>
    %128 = vector.shape_cast %127 : vector<16xf32> to vector<16x1xf32>
    %cst_55 = arith.constant 3.200000e+01 : f32
    %129 = vector.broadcast %cst_55 : f32 to vector<16x1xf32>
    %130 = arith.divf %128, %129 : vector<16x1xf32>
    %131 = vector.broadcast %130 : vector<16x1xf32> to vector<16x32xf32>
    %132 = arith.subf %122, %131 : vector<16x32xf32>
    %133 = arith.mulf %132, %132 : vector<16x32xf32>
    %cst_56 = arith.constant dense<0.000000e+00> : vector<16xf32>
    %134 = vector.multi_reduction <add>, %133, %cst_56 [1] : vector<16x32xf32> to vector<16xf32>
    %135 = vector.shape_cast %134 : vector<16xf32> to vector<16x1xf32>
    %cst_57 = arith.constant 3.200000e+01 : f32
    %136 = vector.broadcast %cst_57 : f32 to vector<16x1xf32>
    %137 = arith.divf %135, %136 : vector<16x1xf32>
    %138 = vector.broadcast %130 : vector<16x1xf32> to vector<16x32xf32>
    %139 = arith.subf %122, %138 : vector<16x32xf32>
    %cst_58 = arith.constant 9.99999996E-13 : f32
    %140 = vector.broadcast %cst_58 : f32 to vector<16x1xf32>
    %141 = arith.addf %137, %140 : vector<16x1xf32>
    %142 = math.rsqrt %141 : vector<16x1xf32>
    %143 = vector.broadcast %142 : vector<16x1xf32> to vector<16x32xf32>
    %144 = arith.mulf %139, %143 : vector<16x32xf32>
    %145 = vector.broadcast %124 : vector<1x32xf32> to vector<16x32xf32>
    %146 = arith.mulf %144, %145 : vector<16x32xf32>
    %147 = vector.broadcast %126 : vector<1x32xf32> to vector<16x32xf32>
    %148 = arith.addf %146, %147 : vector<16x32xf32>
    %c0_59 = arith.constant 0 : index
    %c0_60 = arith.constant 0 : index
    %c0_61 = arith.constant 0 : index
    %149 = vector.load %arg10[%c0_59, %c0_60, %c0_61] : memref<2x32x64xf32, #tpu.memory_space<vmem>>, vector<1x32x64xf32>
    %150 = vector.shape_cast %149 : vector<1x32x64xf32> to vector<32x64xf32>
    %cst_62 = arith.constant dense<0.000000e+00> : vector<16x64xf32>
    %151 = tpu.matmul %148, %150, %cst_62 {dimension_numbers = #tpu.dot_dimension_numbers<[1], [0], [0], [1], [0, 0, 1, 1], [], []>} : vector<16x32xf32>, vector<32x64xf32>, vector<16x64xf32> -> vector<16x64xf32>
    %c0_63 = arith.constant 0 : index
    %c0_64 = arith.constant 0 : index
    %c0_65 = arith.constant 0 : index
    %152 = vector.load %arg11[%c0_63, %c0_64, %c0_65] : memref<2x1x64xf32, #tpu.memory_space<vmem>>, vector<1x1x64xf32>
    %153 = vector.shape_cast %152 : vector<1x1x64xf32> to vector<1x64xf32>
    %154 = vector.broadcast %153 : vector<1x64xf32> to vector<16x64xf32>
    %155 = arith.addf %151, %154 : vector<16x64xf32>
    %156 = arith.mulf %155, %155 : vector<16x64xf32>
    %157 = arith.mulf %155, %156 : vector<16x64xf32>
    %cst_66 = arith.constant 4.471500e-02 : f32
    %158 = vector.broadcast %cst_66 : f32 to vector<16x64xf32>
    %159 = arith.mulf %158, %157 : vector<16x64xf32>
    %160 = arith.addf %155, %159 : vector<16x64xf32>
    %cst_67 = arith.constant 0.797884583 : f32
    %161 = vector.broadcast %cst_67 : f32 to vector<16x64xf32>
    %162 = arith.mulf %161, %160 : vector<16x64xf32>
    %163 = math.tanh %162 : vector<16x64xf32>
    %cst_68 = arith.constant 1.000000e+00 : f32
    %164 = vector.broadcast %cst_68 : f32 to vector<16x64xf32>
    %165 = arith.addf %164, %163 : vector<16x64xf32>
    %cst_69 = arith.constant 5.000000e-01 : f32
    %166 = vector.broadcast %cst_69 : f32 to vector<16x64xf32>
    %167 = arith.mulf %166, %165 : vector<16x64xf32>
    %168 = arith.mulf %155, %167 : vector<16x64xf32>
    %c0_70 = arith.constant 0 : index
    %c0_71 = arith.constant 0 : index
    %c0_72 = arith.constant 0 : index
    %169 = vector.load %arg12[%c0_70, %c0_71, %c0_72] : memref<2x64x32xf32, #tpu.memory_space<vmem>>, vector<1x64x32xf32>
    %170 = vector.shape_cast %169 : vector<1x64x32xf32> to vector<64x32xf32>
    %cst_73 = arith.constant dense<0.000000e+00> : vector<16x32xf32>
    %171 = tpu.matmul %168, %170, %cst_73 {dimension_numbers = #tpu.dot_dimension_numbers<[1], [0], [0], [1], [0, 0, 1, 1], [], []>} : vector<16x64xf32>, vector<64x32xf32>, vector<16x32xf32> -> vector<16x32xf32>
    %c0_74 = arith.constant 0 : index
    %c0_75 = arith.constant 0 : index
    %c0_76 = arith.constant 0 : index
    %172 = vector.load %arg13[%c0_74, %c0_75, %c0_76] : memref<2x1x32xf32, #tpu.memory_space<vmem>>, vector<1x1x32xf32>
    %173 = vector.shape_cast %172 : vector<1x1x32xf32> to vector<1x32xf32>
    %174 = vector.broadcast %173 : vector<1x32xf32> to vector<16x32xf32>
    %175 = arith.addf %171, %174 : vector<16x32xf32>
    %176 = arith.addf %148, %175 : vector<16x32xf32>
    %c0_77 = arith.constant 0 : index
    %c0_78 = arith.constant 0 : index
    %c0_79 = arith.constant 0 : index
    %177 = vector.load %arg14[%c0_77, %c0_78, %c0_79] : memref<2x1x32xf32, #tpu.memory_space<vmem>>, vector<1x1x32xf32>
    %178 = vector.shape_cast %177 : vector<1x1x32xf32> to vector<1x32xf32>
    %c0_80 = arith.constant 0 : index
    %c0_81 = arith.constant 0 : index
    %c0_82 = arith.constant 0 : index
    %179 = vector.load %arg15[%c0_80, %c0_81, %c0_82] : memref<2x1x32xf32, #tpu.memory_space<vmem>>, vector<1x1x32xf32>
    %180 = vector.shape_cast %179 : vector<1x1x32xf32> to vector<1x32xf32>
    %cst_83 = arith.constant dense<0.000000e+00> : vector<16xf32>
    %181 = vector.multi_reduction <add>, %176, %cst_83 [1] : vector<16x32xf32> to vector<16xf32>
    %182 = vector.shape_cast %181 : vector<16xf32> to vector<16x1xf32>
    %cst_84 = arith.constant 3.200000e+01 : f32
    %183 = vector.broadcast %cst_84 : f32 to vector<16x1xf32>
    %184 = arith.divf %182, %183 : vector<16x1xf32>
    %185 = vector.broadcast %184 : vector<16x1xf32> to vector<16x32xf32>
    %186 = arith.subf %176, %185 : vector<16x32xf32>
    %187 = arith.mulf %186, %186 : vector<16x32xf32>
    %cst_85 = arith.constant dense<0.000000e+00> : vector<16xf32>
    %188 = vector.multi_reduction <add>, %187, %cst_85 [1] : vector<16x32xf32> to vector<16xf32>
    %189 = vector.shape_cast %188 : vector<16xf32> to vector<16x1xf32>
    %cst_86 = arith.constant 3.200000e+01 : f32
    %190 = vector.broadcast %cst_86 : f32 to vector<16x1xf32>
    %191 = arith.divf %189, %190 : vector<16x1xf32>
    %192 = vector.broadcast %184 : vector<16x1xf32> to vector<16x32xf32>
    %193 = arith.subf %176, %192 : vector<16x32xf32>
    %cst_87 = arith.constant 9.99999996E-13 : f32
    %194 = vector.broadcast %cst_87 : f32 to vector<16x1xf32>
    %195 = arith.addf %191, %194 : vector<16x1xf32>
    %196 = math.rsqrt %195 : vector<16x1xf32>
    %197 = vector.broadcast %196 : vector<16x1xf32> to vector<16x32xf32>
    %198 = arith.mulf %193, %197 : vector<16x32xf32>
    %199 = vector.broadcast %178 : vector<1x32xf32> to vector<16x32xf32>
    %200 = arith.mulf %198, %199 : vector<16x32xf32>
    %201 = vector.broadcast %180 : vector<1x32xf32> to vector<16x32xf32>
    %202 = arith.addf %200, %201 : vector<16x32xf32>
    %c1_88 = arith.constant 1 : index
    %c0_89 = arith.constant 0 : index
    %c0_90 = arith.constant 0 : index
    %203 = vector.load %arg4[%c1_88, %c0_89, %c0_90] : memref<2x32x96xf32, #tpu.memory_space<vmem>>, vector<1x32x96xf32>
    %204 = vector.shape_cast %203 : vector<1x32x96xf32> to vector<32x96xf32>
    %cst_91 = arith.constant dense<0.000000e+00> : vector<16x96xf32>
    %205 = tpu.matmul %202, %204, %cst_91 {dimension_numbers = #tpu.dot_dimension_numbers<[1], [0], [0], [1], [0, 0, 1, 1], [], []>} : vector<16x32xf32>, vector<32x96xf32>, vector<16x96xf32> -> vector<16x96xf32>
    %c1_92 = arith.constant 1 : index
    %c0_93 = arith.constant 0 : index
    %c0_94 = arith.constant 0 : index
    %206 = vector.load %arg5[%c1_92, %c0_93, %c0_94] : memref<2x1x96xf32, #tpu.memory_space<vmem>>, vector<1x1x96xf32>
    %207 = vector.shape_cast %206 : vector<1x1x96xf32> to vector<1x96xf32>
    %208 = vector.broadcast %207 : vector<1x96xf32> to vector<16x96xf32>
    %209 = arith.addf %205, %208 : vector<16x96xf32>
    %c0_95 = arith.constant 0 : index
    %c0_96 = arith.constant 0 : index
    %c0_97 = arith.constant 0 : index
    %210 = vector.load %arg1[%c0_95, %c0_96, %c0_97] : memref<2x1x8xf32, #tpu.memory_space<vmem>>, vector<1x1x8xf32>
    %211 = vector.shape_cast %210 : vector<1x1x8xf32> to vector<1x8xf32>
    %212 = vector.extract_strided_slice %209 {offsets = [0, 0], sizes = [8, 16], strides = [1, 1]} : vector<16x96xf32> to vector<8x16xf32>
    %213 = vector.extract_strided_slice %209 {offsets = [0, 32], sizes = [8, 16], strides = [1, 1]} : vector<16x96xf32> to vector<8x16xf32>
    %214 = vector.extract_strided_slice %209 {offsets = [0, 64], sizes = [8, 16], strides = [1, 1]} : vector<16x96xf32> to vector<8x16xf32>
    %cst_98 = arith.constant dense<0.000000e+00> : vector<8x8xf32>
    %215 = tpu.matmul %212, %213, %cst_98 {dimension_numbers = #tpu.dot_dimension_numbers<[1], [1], [0], [0], [0, 0, 1, 0], [], []>} : vector<8x16xf32>, vector<8x16xf32>, vector<8x8xf32> -> vector<8x8xf32>
    %cst_99 = arith.constant 2.500000e-01 : f32
    %216 = vector.broadcast %cst_99 : f32 to vector<8x8xf32>
    %217 = arith.mulf %215, %216 : vector<8x8xf32>
    %218 = vector.broadcast %211 : vector<1x8xf32> to vector<8x8xf32>
    %219 = arith.addf %217, %218 : vector<8x8xf32>
    %cst_100 = arith.constant dense<0xFF800000> : vector<8xf32>
    %220 = vector.multi_reduction <maximumf>, %219, %cst_100 [1] : vector<8x8xf32> to vector<8xf32>
    %221 = vector.shape_cast %220 : vector<8xf32> to vector<8x1xf32>
    %222 = vector.broadcast %221 : vector<8x1xf32> to vector<8x8xf32>
    %223 = arith.subf %219, %222 : vector<8x8xf32>
    %224 = math.exp %223 : vector<8x8xf32>
    %cst_101 = arith.constant dense<0.000000e+00> : vector<8xf32>
    %225 = vector.multi_reduction <add>, %224, %cst_101 [1] : vector<8x8xf32> to vector<8xf32>
    %226 = vector.shape_cast %225 : vector<8xf32> to vector<8x1xf32>
    %227 = tpu.reciprocal %226 {approx = true} : vector<8x1xf32> -> vector<8x1xf32>
    %228 = vector.broadcast %227 : vector<8x1xf32> to vector<8x8xf32>
    %229 = arith.mulf %224, %228 : vector<8x8xf32>
    %cst_102 = arith.constant dense<0.000000e+00> : vector<8x16xf32>
    %230 = tpu.matmul %229, %214, %cst_102 {dimension_numbers = #tpu.dot_dimension_numbers<[1], [0], [0], [1], [0, 0, 1, 1], [], []>} : vector<8x8xf32>, vector<8x16xf32>, vector<8x16xf32> -> vector<8x16xf32>
    %231 = vector.extract_strided_slice %209 {offsets = [0, 16], sizes = [8, 16], strides = [1, 1]} : vector<16x96xf32> to vector<8x16xf32>
    %232 = vector.extract_strided_slice %209 {offsets = [0, 48], sizes = [8, 16], strides = [1, 1]} : vector<16x96xf32> to vector<8x16xf32>
    %233 = vector.extract_strided_slice %209 {offsets = [0, 80], sizes = [8, 16], strides = [1, 1]} : vector<16x96xf32> to vector<8x16xf32>
    %cst_103 = arith.constant dense<0.000000e+00> : vector<8x8xf32>
    %234 = tpu.matmul %231, %232, %cst_103 {dimension_numbers = #tpu.dot_dimension_numbers<[1], [1], [0], [0], [0, 0, 1, 0], [], []>} : vector<8x16xf32>, vector<8x16xf32>, vector<8x8xf32> -> vector<8x8xf32>
    %cst_104 = arith.constant 2.500000e-01 : f32
    %235 = vector.broadcast %cst_104 : f32 to vector<8x8xf32>
    %236 = arith.mulf %234, %235 : vector<8x8xf32>
    %237 = vector.broadcast %211 : vector<1x8xf32> to vector<8x8xf32>
    %238 = arith.addf %236, %237 : vector<8x8xf32>
    %cst_105 = arith.constant dense<0xFF800000> : vector<8xf32>
    %239 = vector.multi_reduction <maximumf>, %238, %cst_105 [1] : vector<8x8xf32> to vector<8xf32>
    %240 = vector.shape_cast %239 : vector<8xf32> to vector<8x1xf32>
    %241 = vector.broadcast %240 : vector<8x1xf32> to vector<8x8xf32>
    %242 = arith.subf %238, %241 : vector<8x8xf32>
    %243 = math.exp %242 : vector<8x8xf32>
    %cst_106 = arith.constant dense<0.000000e+00> : vector<8xf32>
    %244 = vector.multi_reduction <add>, %243, %cst_106 [1] : vector<8x8xf32> to vector<8xf32>
    %245 = vector.shape_cast %244 : vector<8xf32> to vector<8x1xf32>
    %246 = tpu.reciprocal %245 {approx = true} : vector<8x1xf32> -> vector<8x1xf32>
    %247 = vector.broadcast %246 : vector<8x1xf32> to vector<8x8xf32>
    %248 = arith.mulf %243, %247 : vector<8x8xf32>
    %cst_107 = arith.constant dense<0.000000e+00> : vector<8x16xf32>
    %249 = tpu.matmul %248, %233, %cst_107 {dimension_numbers = #tpu.dot_dimension_numbers<[1], [0], [0], [1], [0, 0, 1, 1], [], []>} : vector<8x8xf32>, vector<8x16xf32>, vector<8x16xf32> -> vector<8x16xf32>
    %250 = tpu.concatenate %230, %249 in 1 : vector<8x16xf32>, vector<8x16xf32> -> vector<8x32xf32>
    %c1_108 = arith.constant 1 : index
    %c0_109 = arith.constant 0 : index
    %c0_110 = arith.constant 0 : index
    %251 = vector.load %arg1[%c1_108, %c0_109, %c0_110] : memref<2x1x8xf32, #tpu.memory_space<vmem>>, vector<1x1x8xf32>
    %252 = vector.shape_cast %251 : vector<1x1x8xf32> to vector<1x8xf32>
    %253 = vector.extract_strided_slice %209 {offsets = [8, 0], sizes = [8, 16], strides = [1, 1]} : vector<16x96xf32> to vector<8x16xf32>
    %254 = vector.extract_strided_slice %209 {offsets = [8, 32], sizes = [8, 16], strides = [1, 1]} : vector<16x96xf32> to vector<8x16xf32>
    %255 = vector.extract_strided_slice %209 {offsets = [8, 64], sizes = [8, 16], strides = [1, 1]} : vector<16x96xf32> to vector<8x16xf32>
    %cst_111 = arith.constant dense<0.000000e+00> : vector<8x8xf32>
    %256 = tpu.matmul %253, %254, %cst_111 {dimension_numbers = #tpu.dot_dimension_numbers<[1], [1], [0], [0], [0, 0, 1, 0], [], []>} : vector<8x16xf32>, vector<8x16xf32>, vector<8x8xf32> -> vector<8x8xf32>
    %cst_112 = arith.constant 2.500000e-01 : f32
    %257 = vector.broadcast %cst_112 : f32 to vector<8x8xf32>
    %258 = arith.mulf %256, %257 : vector<8x8xf32>
    %259 = vector.broadcast %252 : vector<1x8xf32> to vector<8x8xf32>
    %260 = arith.addf %258, %259 : vector<8x8xf32>
    %cst_113 = arith.constant dense<0xFF800000> : vector<8xf32>
    %261 = vector.multi_reduction <maximumf>, %260, %cst_113 [1] : vector<8x8xf32> to vector<8xf32>
    %262 = vector.shape_cast %261 : vector<8xf32> to vector<8x1xf32>
    %263 = vector.broadcast %262 : vector<8x1xf32> to vector<8x8xf32>
    %264 = arith.subf %260, %263 : vector<8x8xf32>
    %265 = math.exp %264 : vector<8x8xf32>
    %cst_114 = arith.constant dense<0.000000e+00> : vector<8xf32>
    %266 = vector.multi_reduction <add>, %265, %cst_114 [1] : vector<8x8xf32> to vector<8xf32>
    %267 = vector.shape_cast %266 : vector<8xf32> to vector<8x1xf32>
    %268 = tpu.reciprocal %267 {approx = true} : vector<8x1xf32> -> vector<8x1xf32>
    %269 = vector.broadcast %268 : vector<8x1xf32> to vector<8x8xf32>
    %270 = arith.mulf %265, %269 : vector<8x8xf32>
    %cst_115 = arith.constant dense<0.000000e+00> : vector<8x16xf32>
    %271 = tpu.matmul %270, %255, %cst_115 {dimension_numbers = #tpu.dot_dimension_numbers<[1], [0], [0], [1], [0, 0, 1, 1], [], []>} : vector<8x8xf32>, vector<8x16xf32>, vector<8x16xf32> -> vector<8x16xf32>
    %272 = vector.extract_strided_slice %209 {offsets = [8, 16], sizes = [8, 16], strides = [1, 1]} : vector<16x96xf32> to vector<8x16xf32>
    %273 = vector.extract_strided_slice %209 {offsets = [8, 48], sizes = [8, 16], strides = [1, 1]} : vector<16x96xf32> to vector<8x16xf32>
    %274 = vector.extract_strided_slice %209 {offsets = [8, 80], sizes = [8, 16], strides = [1, 1]} : vector<16x96xf32> to vector<8x16xf32>
    %cst_116 = arith.constant dense<0.000000e+00> : vector<8x8xf32>
    %275 = tpu.matmul %272, %273, %cst_116 {dimension_numbers = #tpu.dot_dimension_numbers<[1], [1], [0], [0], [0, 0, 1, 0], [], []>} : vector<8x16xf32>, vector<8x16xf32>, vector<8x8xf32> -> vector<8x8xf32>
    %cst_117 = arith.constant 2.500000e-01 : f32
    %276 = vector.broadcast %cst_117 : f32 to vector<8x8xf32>
    %277 = arith.mulf %275, %276 : vector<8x8xf32>
    %278 = vector.broadcast %252 : vector<1x8xf32> to vector<8x8xf32>
    %279 = arith.addf %277, %278 : vector<8x8xf32>
    %cst_118 = arith.constant dense<0xFF800000> : vector<8xf32>
    %280 = vector.multi_reduction <maximumf>, %279, %cst_118 [1] : vector<8x8xf32> to vector<8xf32>
    %281 = vector.shape_cast %280 : vector<8xf32> to vector<8x1xf32>
    %282 = vector.broadcast %281 : vector<8x1xf32> to vector<8x8xf32>
    %283 = arith.subf %279, %282 : vector<8x8xf32>
    %284 = math.exp %283 : vector<8x8xf32>
    %cst_119 = arith.constant dense<0.000000e+00> : vector<8xf32>
    %285 = vector.multi_reduction <add>, %284, %cst_119 [1] : vector<8x8xf32> to vector<8xf32>
    %286 = vector.shape_cast %285 : vector<8xf32> to vector<8x1xf32>
    %287 = tpu.reciprocal %286 {approx = true} : vector<8x1xf32> -> vector<8x1xf32>
    %288 = vector.broadcast %287 : vector<8x1xf32> to vector<8x8xf32>
    %289 = arith.mulf %284, %288 : vector<8x8xf32>
    %cst_120 = arith.constant dense<0.000000e+00> : vector<8x16xf32>
    %290 = tpu.matmul %289, %274, %cst_120 {dimension_numbers = #tpu.dot_dimension_numbers<[1], [0], [0], [1], [0, 0, 1, 1], [], []>} : vector<8x8xf32>, vector<8x16xf32>, vector<8x16xf32> -> vector<8x16xf32>
    %291 = tpu.concatenate %271, %290 in 1 : vector<8x16xf32>, vector<8x16xf32> -> vector<8x32xf32>
    %292 = tpu.concatenate %250, %291 in 0 : vector<8x32xf32>, vector<8x32xf32> -> vector<16x32xf32>
    %c1_121 = arith.constant 1 : index
    %c0_122 = arith.constant 0 : index
    %c0_123 = arith.constant 0 : index
    %293 = vector.load %arg6[%c1_121, %c0_122, %c0_123] : memref<2x32x32xf32, #tpu.memory_space<vmem>>, vector<1x32x32xf32>
    %294 = vector.shape_cast %293 : vector<1x32x32xf32> to vector<32x32xf32>
    %cst_124 = arith.constant dense<0.000000e+00> : vector<16x32xf32>
    %295 = tpu.matmul %292, %294, %cst_124 {dimension_numbers = #tpu.dot_dimension_numbers<[1], [0], [0], [1], [0, 0, 1, 1], [], []>} : vector<16x32xf32>, vector<32x32xf32>, vector<16x32xf32> -> vector<16x32xf32>
    %c1_125 = arith.constant 1 : index
    %c0_126 = arith.constant 0 : index
    %c0_127 = arith.constant 0 : index
    %296 = vector.load %arg7[%c1_125, %c0_126, %c0_127] : memref<2x1x32xf32, #tpu.memory_space<vmem>>, vector<1x1x32xf32>
    %297 = vector.shape_cast %296 : vector<1x1x32xf32> to vector<1x32xf32>
    %298 = vector.broadcast %297 : vector<1x32xf32> to vector<16x32xf32>
    %299 = arith.addf %295, %298 : vector<16x32xf32>
    %300 = arith.addf %202, %299 : vector<16x32xf32>
    %c1_128 = arith.constant 1 : index
    %c0_129 = arith.constant 0 : index
    %c0_130 = arith.constant 0 : index
    %301 = vector.load %arg8[%c1_128, %c0_129, %c0_130] : memref<2x1x32xf32, #tpu.memory_space<vmem>>, vector<1x1x32xf32>
    %302 = vector.shape_cast %301 : vector<1x1x32xf32> to vector<1x32xf32>
    %c1_131 = arith.constant 1 : index
    %c0_132 = arith.constant 0 : index
    %c0_133 = arith.constant 0 : index
    %303 = vector.load %arg9[%c1_131, %c0_132, %c0_133] : memref<2x1x32xf32, #tpu.memory_space<vmem>>, vector<1x1x32xf32>
    %304 = vector.shape_cast %303 : vector<1x1x32xf32> to vector<1x32xf32>
    %cst_134 = arith.constant dense<0.000000e+00> : vector<16xf32>
    %305 = vector.multi_reduction <add>, %300, %cst_134 [1] : vector<16x32xf32> to vector<16xf32>
    %306 = vector.shape_cast %305 : vector<16xf32> to vector<16x1xf32>
    %cst_135 = arith.constant 3.200000e+01 : f32
    %307 = vector.broadcast %cst_135 : f32 to vector<16x1xf32>
    %308 = arith.divf %306, %307 : vector<16x1xf32>
    %309 = vector.broadcast %308 : vector<16x1xf32> to vector<16x32xf32>
    %310 = arith.subf %300, %309 : vector<16x32xf32>
    %311 = arith.mulf %310, %310 : vector<16x32xf32>
    %cst_136 = arith.constant dense<0.000000e+00> : vector<16xf32>
    %312 = vector.multi_reduction <add>, %311, %cst_136 [1] : vector<16x32xf32> to vector<16xf32>
    %313 = vector.shape_cast %312 : vector<16xf32> to vector<16x1xf32>
    %cst_137 = arith.constant 3.200000e+01 : f32
    %314 = vector.broadcast %cst_137 : f32 to vector<16x1xf32>
    %315 = arith.divf %313, %314 : vector<16x1xf32>
    %316 = vector.broadcast %308 : vector<16x1xf32> to vector<16x32xf32>
    %317 = arith.subf %300, %316 : vector<16x32xf32>
    %cst_138 = arith.constant 9.99999996E-13 : f32
    %318 = vector.broadcast %cst_138 : f32 to vector<16x1xf32>
    %319 = arith.addf %315, %318 : vector<16x1xf32>
    %320 = math.rsqrt %319 : vector<16x1xf32>
    %321 = vector.broadcast %320 : vector<16x1xf32> to vector<16x32xf32>
    %322 = arith.mulf %317, %321 : vector<16x32xf32>
    %323 = vector.broadcast %302 : vector<1x32xf32> to vector<16x32xf32>
    %324 = arith.mulf %322, %323 : vector<16x32xf32>
    %325 = vector.broadcast %304 : vector<1x32xf32> to vector<16x32xf32>
    %326 = arith.addf %324, %325 : vector<16x32xf32>
    %c1_139 = arith.constant 1 : index
    %c0_140 = arith.constant 0 : index
    %c0_141 = arith.constant 0 : index
    %327 = vector.load %arg10[%c1_139, %c0_140, %c0_141] : memref<2x32x64xf32, #tpu.memory_space<vmem>>, vector<1x32x64xf32>
    %328 = vector.shape_cast %327 : vector<1x32x64xf32> to vector<32x64xf32>
    %cst_142 = arith.constant dense<0.000000e+00> : vector<16x64xf32>
    %329 = tpu.matmul %326, %328, %cst_142 {dimension_numbers = #tpu.dot_dimension_numbers<[1], [0], [0], [1], [0, 0, 1, 1], [], []>} : vector<16x32xf32>, vector<32x64xf32>, vector<16x64xf32> -> vector<16x64xf32>
    %c1_143 = arith.constant 1 : index
    %c0_144 = arith.constant 0 : index
    %c0_145 = arith.constant 0 : index
    %330 = vector.load %arg11[%c1_143, %c0_144, %c0_145] : memref<2x1x64xf32, #tpu.memory_space<vmem>>, vector<1x1x64xf32>
    %331 = vector.shape_cast %330 : vector<1x1x64xf32> to vector<1x64xf32>
    %332 = vector.broadcast %331 : vector<1x64xf32> to vector<16x64xf32>
    %333 = arith.addf %329, %332 : vector<16x64xf32>
    %334 = arith.mulf %333, %333 : vector<16x64xf32>
    %335 = arith.mulf %333, %334 : vector<16x64xf32>
    %cst_146 = arith.constant 4.471500e-02 : f32
    %336 = vector.broadcast %cst_146 : f32 to vector<16x64xf32>
    %337 = arith.mulf %336, %335 : vector<16x64xf32>
    %338 = arith.addf %333, %337 : vector<16x64xf32>
    %cst_147 = arith.constant 0.797884583 : f32
    %339 = vector.broadcast %cst_147 : f32 to vector<16x64xf32>
    %340 = arith.mulf %339, %338 : vector<16x64xf32>
    %341 = math.tanh %340 : vector<16x64xf32>
    %cst_148 = arith.constant 1.000000e+00 : f32
    %342 = vector.broadcast %cst_148 : f32 to vector<16x64xf32>
    %343 = arith.addf %342, %341 : vector<16x64xf32>
    %cst_149 = arith.constant 5.000000e-01 : f32
    %344 = vector.broadcast %cst_149 : f32 to vector<16x64xf32>
    %345 = arith.mulf %344, %343 : vector<16x64xf32>
    %346 = arith.mulf %333, %345 : vector<16x64xf32>
    %c1_150 = arith.constant 1 : index
    %c0_151 = arith.constant 0 : index
    %c0_152 = arith.constant 0 : index
    %347 = vector.load %arg12[%c1_150, %c0_151, %c0_152] : memref<2x64x32xf32, #tpu.memory_space<vmem>>, vector<1x64x32xf32>
    %348 = vector.shape_cast %347 : vector<1x64x32xf32> to vector<64x32xf32>
    %cst_153 = arith.constant dense<0.000000e+00> : vector<16x32xf32>
    %349 = tpu.matmul %346, %348, %cst_153 {dimension_numbers = #tpu.dot_dimension_numbers<[1], [0], [0], [1], [0, 0, 1, 1], [], []>} : vector<16x64xf32>, vector<64x32xf32>, vector<16x32xf32> -> vector<16x32xf32>
    %c1_154 = arith.constant 1 : index
    %c0_155 = arith.constant 0 : index
    %c0_156 = arith.constant 0 : index
    %350 = vector.load %arg13[%c1_154, %c0_155, %c0_156] : memref<2x1x32xf32, #tpu.memory_space<vmem>>, vector<1x1x32xf32>
    %351 = vector.shape_cast %350 : vector<1x1x32xf32> to vector<1x32xf32>
    %352 = vector.broadcast %351 : vector<1x32xf32> to vector<16x32xf32>
    %353 = arith.addf %349, %352 : vector<16x32xf32>
    %354 = arith.addf %326, %353 : vector<16x32xf32>
    %c1_157 = arith.constant 1 : index
    %c0_158 = arith.constant 0 : index
    %c0_159 = arith.constant 0 : index
    %355 = vector.load %arg14[%c1_157, %c0_158, %c0_159] : memref<2x1x32xf32, #tpu.memory_space<vmem>>, vector<1x1x32xf32>
    %356 = vector.shape_cast %355 : vector<1x1x32xf32> to vector<1x32xf32>
    %c1_160 = arith.constant 1 : index
    %c0_161 = arith.constant 0 : index
    %c0_162 = arith.constant 0 : index
    %357 = vector.load %arg15[%c1_160, %c0_161, %c0_162] : memref<2x1x32xf32, #tpu.memory_space<vmem>>, vector<1x1x32xf32>
    %358 = vector.shape_cast %357 : vector<1x1x32xf32> to vector<1x32xf32>
    %cst_163 = arith.constant dense<0.000000e+00> : vector<16xf32>
    %359 = vector.multi_reduction <add>, %354, %cst_163 [1] : vector<16x32xf32> to vector<16xf32>
    %360 = vector.shape_cast %359 : vector<16xf32> to vector<16x1xf32>
    %cst_164 = arith.constant 3.200000e+01 : f32
    %361 = vector.broadcast %cst_164 : f32 to vector<16x1xf32>
    %362 = arith.divf %360, %361 : vector<16x1xf32>
    %363 = vector.broadcast %362 : vector<16x1xf32> to vector<16x32xf32>
    %364 = arith.subf %354, %363 : vector<16x32xf32>
    %365 = arith.mulf %364, %364 : vector<16x32xf32>
    %cst_165 = arith.constant dense<0.000000e+00> : vector<16xf32>
    %366 = vector.multi_reduction <add>, %365, %cst_165 [1] : vector<16x32xf32> to vector<16xf32>
    %367 = vector.shape_cast %366 : vector<16xf32> to vector<16x1xf32>
    %cst_166 = arith.constant 3.200000e+01 : f32
    %368 = vector.broadcast %cst_166 : f32 to vector<16x1xf32>
    %369 = arith.divf %367, %368 : vector<16x1xf32>
    %370 = vector.broadcast %362 : vector<16x1xf32> to vector<16x32xf32>
    %371 = arith.subf %354, %370 : vector<16x32xf32>
    %cst_167 = arith.constant 9.99999996E-13 : f32
    %372 = vector.broadcast %cst_167 : f32 to vector<16x1xf32>
    %373 = arith.addf %369, %372 : vector<16x1xf32>
    %374 = math.rsqrt %373 : vector<16x1xf32>
    %375 = vector.broadcast %374 : vector<16x1xf32> to vector<16x32xf32>
    %376 = arith.mulf %371, %375 : vector<16x32xf32>
    %377 = vector.broadcast %356 : vector<1x32xf32> to vector<16x32xf32>
    %378 = arith.mulf %376, %377 : vector<16x32xf32>
    %379 = vector.broadcast %358 : vector<1x32xf32> to vector<16x32xf32>
    %380 = arith.addf %378, %379 : vector<16x32xf32>
    %381 = vector.extract_strided_slice %380 {offsets = [0, 0], sizes = [1, 32], strides = [1, 1]} : vector<16x32xf32> to vector<1x32xf32>
    %382 = vector.extract_strided_slice %380 {offsets = [8, 0], sizes = [1, 32], strides = [1, 1]} : vector<16x32xf32> to vector<1x32xf32>
    %383 = tpu.concatenate %381, %382 in 0 : vector<1x32xf32>, vector<1x32xf32> -> vector<2x32xf32>
    %c0_168 = arith.constant 0 : index
    %c0_169 = arith.constant 0 : index
    %384 = vector.load %arg16[%c0_168, %c0_169] : memref<32x32xf32, #tpu.memory_space<vmem>>, vector<32x32xf32>
    %cst_170 = arith.constant dense<0.000000e+00> : vector<2x32xf32>
    %385 = tpu.matmul %383, %384, %cst_170 {dimension_numbers = #tpu.dot_dimension_numbers<[1], [0], [0], [1], [0, 0, 1, 1], [], []>} : vector<2x32xf32>, vector<32x32xf32>, vector<2x32xf32> -> vector<2x32xf32>
    %c0_171 = arith.constant 0 : index
    %c0_172 = arith.constant 0 : index
    %386 = vector.load %arg17[%c0_171, %c0_172] : memref<1x32xf32, #tpu.memory_space<vmem>>, vector<1x32xf32>
    %387 = vector.broadcast %386 : vector<1x32xf32> to vector<2x32xf32>
    %388 = arith.addf %385, %387 : vector<2x32xf32>
    %389 = math.tanh %388 : vector<2x32xf32>
    %c0_173 = arith.constant 0 : index
    %c0_174 = arith.constant 0 : index
    %390 = vector.load %arg18[%c0_173, %c0_174] : memref<32x128xf32, #tpu.memory_space<vmem>>, vector<32x128xf32>
    %cst_175 = arith.constant dense<0.000000e+00> : vector<2x128xf32>
    %391 = tpu.matmul %389, %390, %cst_175 {dimension_numbers = #tpu.dot_dimension_numbers<[1], [0], [0], [1], [0, 0, 1, 1], [], []>} : vector<2x32xf32>, vector<32x128xf32>, vector<2x128xf32> -> vector<2x128xf32>
    %c0_176 = arith.constant 0 : index
    %c0_177 = arith.constant 0 : index
    %392 = vector.load %arg19[%c0_176, %c0_177] : memref<1x128xf32, #tpu.memory_space<vmem>>, vector<1x128xf32>
    %393 = vector.broadcast %392 : vector<1x128xf32> to vector<2x128xf32>
    %394 = arith.addf %391, %393 : vector<2x128xf32>
    %c0_178 = arith.constant 0 : index
    %c0_179 = arith.constant 0 : index
    %395 = vector.load %arg20[%c0_178, %c0_179] : memref<2x128xf32, #tpu.memory_space<vmem>>, vector<2x128xf32>
    tpu.vector_store %arg20[%c0_178, %c0_179], %394 {strides = array<i32>} : memref<2x128xf32, #tpu.memory_space<vmem>>, vector<2x128xf32>,
    return
  }
}

</mosaic_0001>

<bundles_post_ra>
// kernel: bert_for_classification.1
= control target key start
LH: loop header
LB: loop body
LE: loop exit
PB: predicated region body
PF: predicated region fallthrough
CT: control target
= control target key end

     0   :  { %s3795_s0 = inlined_call_operand.vmem [shape: f32[16,32], index: 0, kind: input, shape index: {}]   ;;  %s3796_s1 = inlined_call_operand.vmem [shape: f32[2,1,8], index: 1, kind: input, shape index: {}]   ;;  %s3797_s2 = inlined_call_operand.vmem [shape: f32[1,32], index: 2, kind: input, shape index: {}]   ;;  %s3798_s3 = inlined_call_operand.vmem [shape: f32[1,32], index: 3, kind: input, shape index: {}]   ;;  %s3799_s4 = inlined_call_operand.vmem [shape: f32[2,32,96], index: 4, kind: input, shape index: {}]   ;;  %s3800_s5 = inlined_call_operand.vmem [shape: f32[2,1,96], index: 5, kind: input, shape index: {}]   ;;  %s3801_s6 = inlined_call_operand.vmem [shape: f32[2,32,32], index: 6, kind: input, shape index: {}]   ;;  %s3802_s7 = inlined_call_operand.vmem [shape: f32[2,1,32], index: 7, kind: input, shape index: {}]   ;;  %s3803_s8 = inlined_call_operand.vmem [shape: f32[2,1,32], index: 8, kind: input, shape index: {}]   ;;  %s3804_s9 = inlined_call_operand.vmem [shape: f32[2,1,32], index: 9, kind: input, shape index: {}]   ;;  %s3805_s10 = inlined_call_operand.vmem [shape: f32[2,32,64], index: 10, kind: input, shape index: {}]   ;;  %s3806_s11 = inlined_call_operand.vmem [shape: f32[2,1,64], index: 11, kind: input, shape index: {}]   ;;  %s3807_s12 = inlined_call_operand.vmem [shape: f32[2,64,32], index: 12, kind: input, shape index: {}]   ;;  %s3808_s13 = inlined_call_operand.vmem [shape: f32[2,1,32], index: 13, kind: input, shape index: {}]   ;;  %s3809_s14 = inlined_call_operand.vmem [shape: f32[2,1,32], index: 14, kind: input, shape index: {}]   ;;  %s3810_s15 = inlined_call_operand.vmem [shape: f32[2,1,32], index: 15, kind: input, shape index: {}]   ;;  %s3811_s16 = inlined_call_operand.vmem [shape: f32[32,32], index: 16, kind: input, shape index: {}]   ;;  %s3812_s17 = inlined_call_operand.vmem [shape: f32[1,32], index: 17, kind: input, shape index: {}]   ;;  %s3813_s18 = inlined_call_operand.vmem [shape: f32[32,128], index: 18, kind: input, shape index: {}]   ;;  %s3814_s19 = inlined_call_operand.vmem [shape: f32[1,128], index: 19, kind: input, shape index: {}]   ;;  %s3815_s20 = inlined_call_operand.hbm [shape: f32[2,128], index: 20, kind: output, shape index: {}]  }
   0x1   :  { %3819 = sst [smem:[#allocation5_spill]] %s3795_s0 }
   0x2   :  { %3820 = sst [smem:[#allocation6_spill]] %s3796_s1 }
   0x3   :  { %3821 = sst [smem:[#allocation7_spill]] %s3797_s2 }
   0x4   :  { %3822 = sst [smem:[#allocation8_spill]] %s3798_s3 }
   0x5   :  { %3823 = sst [smem:[#allocation9_spill]] %s3799_s4 }
   0x6   :  { %s3824_s23 = sld [smem:[#allocation5_spill]]  ;;  %vm70_vm0 = vcmask 261120  }
   0xc   :  { %v66_v0 = vld [vmem:[%s3824_s23] sm:$0xff]  ;;  %v67_v1 = vld [vmem:[%s3824_s23 + $0x8] sm:$0xff] }
   0xd   :  { %25 = vsyncpa [#allocation3], 0  ;;  %v71_v2 = vsel %vm70_vm0, %v66_v0, 0.0  ;;  %v74_v3 = vsel %vm70_vm0, %v67_v1, 0.0  ;;  %s3825_s26 = sld [smem:[#allocation9_spill]]  ;;  %s3826_s22 = sld [smem:[#allocation7_spill]] }
   0xe   :  { %72 = vadd.xlane.f32.xlu0 %v71_v2  ;;  %s3827_s2 = sld [smem:[#allocation8_spill]]  ;;  %v3234_v36 = vmov 0.0   ;;  %vm3235_vm1 = vmmov 0   ;;  %v2651_v37 = vld [vmem:[%s3800_s5] ss:$0 sm:$0xff]  ;;  %s3236_s27 = smov 80  }
   0xf   :  { %2851 = vmatprep.subr.mxu1 %v3234_v36  ;;  %2853 = vmatprep.mubr.msk.f32.mxu1 %vm3235_vm1, %v3234_v36  ;;  %s3237_s28 = smov 96   ;;  %s3238_s4 = smov 112   ;;  %vm210_vm2 = vcmask 130048   ;;  %vm293_vm3 = vcmask 64512   ;;  %vm1162_vm4 = vcmask 523264   ;;  %vm2463_vm5 = vcmask 1040384  }
  0x10   :  { %s3828_s0 = sld [smem:[#allocation6_spill]]  ;;  %s3240_s23 = smov 64  }
  0x11   :  { %s3241_s1 = smov 16  }
  0x12   :  { %75 = vadd.xlane.f32.xlu0 %v74_v3 }
  0x13   :  { %v114_v14 = vld [vmem:[%s3825_s26] sm:$0xff]  ;;  %v115_v15 = vld [vmem:[%s3825_s26 + $0x8] sm:$0xff]  ;;  %v116_v16 = vld [vmem:[%s3825_s26 + $0x10] sm:$0xff] }
  0x14   :  { %v3046_v17 = vpack.c.bf16 %v115_v15, %v114_v14  ;;  %v117_v18 = vld [vmem:[%s3825_s26 + $0x18] sm:$0xff]  ;;  %v2649_v27 = vld [vmem:[%s3826_s22] ss:$0 sm:$0xff]  ;;  %s3239_s22 = smov 48  }
  0x15   :  { %v3050_v19 = vpack.c.bf16 %v117_v18, %v116_v16  ;;  %v2650_v29 = vld [vmem:[%s3827_s2] ss:$0 sm:$0xff] }
  0x16   :  { %3047 = vmatprep.subr.bf16.mxu0 %v3046_v17  ;;  %v3432_v49 = vld [vmem:[%s3828_s0] ss:$0 sm:$0xff]  ;;  %v3441_v60 = vld [vmem:[%s3828_s0 + $0x1] ss:$0 sm:$0xff] }
  0x17   :  { %3049 = vmatpush3.bf16.msra.mxu0 %v3046_v17 }
  0x18   :  { %3051 = vmatprep.subr.bf16.mxu0 %v3050_v19 }
  0x1b   :  { %3053 = vmatpush3.bf16.msra.mxu0 %v3050_v19 }
  0x1c   :  { %2861 = vmatprep.subr.mxu0 %v3234_v36 }
  0x9b   :  { %v73_v4 = vpop.xlane.xlu0 %72 }
  0x9c   :  { %v78_v5 = vmul.f32 0.03125, %v73_v4 }
  0x9e   :  { %v80_v6 = vsub.f32 %v66_v0, %v78_v5 }
  0x9f   :  { %v76_v7 = vpop.xlane.xlu0 %75 }
  0xa0   :  { %v79_v8 = vmul.f32 0.03125, %v76_v7  ;;  %v82_v9 = vmul.f32 %v80_v6, %v80_v6 }
  0xa2   :  { %v81_v10 = vsub.f32 %v67_v1, %v79_v8  ;;  %v84_v11 = vsel %vm70_vm0, %v82_v9, 0.0 }
  0xa3   :  { %85 = vadd.xlane.f32.xlu1 %v84_v11 }
  0xa4   :  { %v83_v12 = vmul.f32 %v81_v10, %v81_v10 }
  0xa6   :  { %v87_v13 = vsel %vm70_vm0, %v83_v12, 0.0 }
  0xa7   :  { %88 = vadd.xlane.f32.xlu1 %v87_v13 }
 0x130   :  { %v86_v20 = vpop.xlane.xlu1 %85 }
 0x131   :  { %v90_v21 = vmul.f32 0.03125, %v86_v20 }
 0x133   :  { %v92_v22 = vadd.f32 1e-12, %v90_v21 }
 0x134   :  { %v89_v23 = vpop.xlane.xlu1 %88 }
 0x135   :  { %3148 = vrsqrt.f32 %v92_v22  ;;  %v91_v24 = vmul.f32 0.03125, %v89_v23 }
 0x137   :  { %v93_v25 = vadd.f32 1e-12, %v91_v24 }
 0x139   :  { %3150 = vrsqrt.f32 %v93_v25 }
 0x13f   :  { %v3149_v26 = vpop.eup %3148 }
 0x140   :  { %v96_v28 = vmul.f32 %v3149_v26, %v80_v6 }
 0x142   :  { %v104_v30 = vmul.f32 %v2649_v27, %v96_v28 }
 0x143   :  { %v3151_v31 = vpop.eup %3150 }
 0x144   :  { %v97_v32 = vmul.f32 %v3151_v31, %v81_v10  ;;  %v3377_v33 = vadd.f32 %v2650_v29, %v104_v30 }
 0x146   :  { %v105_v34 = vmul.f32 %v2649_v27, %v97_v32  ;;  %2848 = vmatprep.mubr.msk.f32.mxu0 %vm70_vm0, %v3377_v33 }
 0x148   :  { %v3381_v35 = vadd.f32 %v2650_v29, %v105_v34 }
 0x14a   :  { %2849 = vmatmul.mubr.msk.f32.vlgmr.msra.gmra.mrb[0].mxu0 %vm70_vm0, %v3381_v35 }
 0x14b   :  { %2863 = vmatprep.mubr.msk.f32.mxu0 %vm3235_vm1, %v3234_v36 }
 0x21d   :  { %v2850_v38 = vpop.f32.mrb[0].mxu0 }
 0x21e   :  { %v197_v39 = vpop.f32.mrb[1].mxu0  ;;  %v3400_v41 = vadd.f32 %v2850_v38, %v2651_v37 }
 0x21f   :  { %v3394_v40 = vadd.f32 %v2651_v37, %v197_v39 }
 0x221   :  { %383 = vrot.lane.b32.xlu1 %v3394_v40, %s3236_s27  ;;  %208 = vrot.lane.b32.xlu0 %v3394_v40, %s3237_s28 }
 0x225   :  { %381 = vrot.lane.b32.xlu1 %v3394_v40, %s3238_s4  ;;  %729 = vrot.lane.b32.xlu0 %v3400_v41, %s3236_s27 }
 0x229   :  { %556 = vrot.lane.b32.xlu1 %v3400_v41, %s3237_s28 }
 0x22d   :  { %727 = vrot.lane.b32.xlu1 %v3400_v41, %s3238_s4 }
 0x293   :  { %v384_v42 = vpop.permute.xlu1 %383  ;;  %v209_v43 = vpop.permute.xlu0 %208 }
 0x294   :  { %2852 = vmatpush3.xpose.msk.msra.mxu1 %vm210_vm2, %v209_v43  ;;  %2862 = vmatpush3.xpose.msk.msra.mxu0 %vm210_vm2, %v384_v42 }
 0x295   :  { %2871 = vmatprep.subr.mxu0 %v3234_v36  ;;  %2856 = vmatprep.subr.mxu1 %v3234_v36 }
 0x297   :  { %v382_v44 = vpop.permute.xlu1 %381  ;;  %2854 = vmatmul.mubr.msk.f32.vlgmr.msra.gmra.mrb[0].mxu1 %vm210_vm2, %v3394_v40  ;;  %v730_v46 = vpop.permute.xlu0 %729 }
 0x298   :  { %2864 = vmatmul.mubr.msk.f32.vlgmr.msra.gmra.mrb[2].mxu0 %vm210_vm2, %v382_v44  ;;  %2858 = vmatprep.mubr.msk.f32.mxu1 %vm3235_vm1, %v3234_v36 }
 0x299   :  { %2873 = vmatprep.mubr.msk.f32.mxu0 %vm3235_vm1, %v3234_v36 }
 0x29b   :  { %v557_v45 = vpop.permute.xlu1 %556 }
 0x29c   :  { %2872 = vmatpush3.xpose.msk.msra.mxu0 %vm210_vm2, %v557_v45  ;;  %v899_v45 = vld [vmem:[%s3801_s6] sm:$0xff] }
 0x29d   :  { %2881 = vmatprep.subr.mxu0 %v3234_v36 }
 0x29f   :  { %2874 = vmatmul.mubr.msk.f32.vlgmr.msra.gmra.mrb[4].mxu0 %vm210_vm2, %v3400_v41  ;;  %v728_v47 = vpop.permute.xlu1 %727 }
 0x2a0   :  { %2882 = vmatpush3.xpose.msk.msra.mxu0 %vm210_vm2, %v730_v46  ;;  %2883 = vmatprep.mubr.msk.f32.mxu0 %vm3235_vm1, %v3234_v36  ;;  %v900_v46 = vld [vmem:[%s3801_s6 + $0x8] sm:$0xff] }
 0x2a3   :  { %2884 = vmatmul.mubr.msk.f32.vlgmr.msra.gmra.mrb[6].mxu0 %vm210_vm2, %v728_v47  ;;  %v901_v47 = vld [vmem:[%s3801_s6 + $0x10] sm:$0xff] }
 0x36a   :  { %v281_v48 = vpop.f32.mrb[0].mxu1 }
 0x36b   :  { %v285_v50 = vmul.f32 0.25, %v281_v48  ;;  %v2855_v51 = vpop.f32.mrb[1].mxu1  ;;  %v455_v52 = vpop.f32.mrb[2].mxu0  ;;  %v3054_v48 = vpack.c.bf16 %v900_v46, %v899_v45  ;;  %v1149_v46 = vld [vmem:[%s3807_s12 + $0x10] sm:$0xff] }
 0x36c   :  { %v459_v53 = vmul.f32 0.25, %v455_v52  ;;  %v2865_v54 = vpop.f32.mrb[3].mxu0 }
 0x36d   :  { %v292_v55 = vadd.f32 %v3432_v49, %v285_v50  ;;  %v902_v50 = vld [vmem:[%s3801_s6 + $0x18] sm:$0xff]  ;;  %3055 = vmatprep.subr.bf16.mxu0 %v3054_v48 }
 0x36e   :  { %v460_v56 = vadd.f32 %v3432_v49, %v459_v53  ;;  %v3058_v51 = vpack.c.bf16 %v902_v50, %v901_v47  ;;  %3057 = vmatpush3.bf16.msra.mxu0 %v3054_v48  ;;  %v1150_v47 = vld [vmem:[%s3807_s12 + $0x18] sm:$0xff]  ;;  %v1151_v50 = vld [vmem:[%s3807_s12 + $0x20] sm:$0xff] }
 0x36f   :  { %v294_v57 = vsel %vm293_vm3, %v292_v55, -inf  ;;  %v3074_v48 = vpack.c.bf16 %v1150_v47, %v1149_v46 }
 0x370   :  { %295 = vmax.xlane.f32.xlu0 %v294_v57  ;;  %v461_v58 = vsel %vm293_vm3, %v460_v56, -inf  ;;  %3059 = vmatprep.subr.bf16.mxu0 %v3058_v51 }
 0x371   :  { %462 = vmax.xlane.f32.xlu1 %v461_v58 }
 0x372   :  { %v628_v59 = vpop.f32.mrb[4].mxu0  ;;  %3061 = vmatpush3.bf16.msra.mxu0 %v3058_v51  ;;  %v1152_v51 = vld [vmem:[%s3807_s12 + $0x28] sm:$0xff] }
 0x373   :  { %v632_v61 = vmul.f32 0.25, %v628_v59  ;;  %v2875_v62 = vpop.f32.mrb[5].mxu0 }
 0x375   :  { %v639_v63 = vadd.f32 %v3441_v60, %v632_v61 }
 0x376   :  { %v801_v0 = vpop.f32.mrb[6].mxu0 }
 0x377   :  { %v805_v1 = vmul.f32 0.25, %v801_v0  ;;  %v2885_v2 = vpop.f32.mrb[7].mxu0  ;;  %v640_v3 = vsel %vm293_vm3, %v639_v63, -inf }
 0x378   :  { %641 = vmax.xlane.f32.xlu0 %v640_v3 }
 0x379   :  { %v806_v4 = vadd.f32 %v3441_v60, %v805_v1  ;;  %v2669_v1 = vld [vmem:[%s3802_s7] ss:$0 sm:$0xff] }
 0x37b   :  { %v807_v5 = vsel %vm293_vm3, %v806_v4, -inf }
 0x37c   :  { %808 = vmax.xlane.f32.xlu0 %v807_v5 }
 0x3fd   :  { %v296_v6 = vpop.xlane.xlu0 %295 }
 0x3fe   :  { %v297_v7 = vsub.f32 %v292_v55, %v296_v6  ;;  %v463_v8 = vpop.xlane.xlu1 %462 }
 0x3ff   :  { %v464_v9 = vsub.f32 %v460_v56, %v463_v8 }
 0x400   :  { %v298_v10 = vmul.f32 1.442695, %v297_v7 }
 0x401   :  { %v465_v11 = vmul.f32 1.442695, %v464_v9 }
 0x402   :  { %3152 = vpow2.f32 %v298_v10 }
 0x403   :  { %3154 = vpow2.f32 %v465_v11 }
 0x405   :  { %v642_v12 = vpop.xlane.xlu0 %641 }
 0x406   :  { %v643_v13 = vsub.f32 %v639_v63, %v642_v12 }
 0x408   :  { %v644_v14 = vmul.f32 1.442695, %v643_v13 }
 0x409   :  { %v809_v21 = vpop.xlane.xlu0 %808 }
 0x40a   :  { %3156 = vpow2.f32 %v644_v14  ;;  %v810_v22 = vsub.f32 %v806_v4, %v809_v21  ;;  %v1039_v21 = vld [vmem:[%s3805_s10 + $0x10] sm:$0xff] }
 0x40c   :  { %v3153_v15 = vpop.eup %3152  ;;  %v811_v23 = vmul.f32 1.442695, %v810_v22  ;;  %v1040_v22 = vld [vmem:[%s3805_s10 + $0x18] sm:$0xff] }
 0x40d   :  { %v3155_v16 = vpop.eup %3154  ;;  %v300_v17 = vsel %vm293_vm3, %v3153_v15, 0.0 }
 0x40e   :  { %301 = vadd.xlane.f32.xlu0 %v300_v17  ;;  %v467_v18 = vsel %vm293_vm3, %v3155_v16, 0.0  ;;  %3158 = vpow2.f32 %v811_v23  ;;  %v3066_v23 = vpack.c.bf16 %v1040_v22, %v1039_v21 }
 0x40f   :  { %468 = vadd.xlane.f32.xlu1 %v467_v18 }
 0x414   :  { %v3157_v19 = vpop.eup %3156 }
 0x415   :  { %v646_v20 = vsel %vm293_vm3, %v3157_v19, 0.0 }
 0x416   :  { %647 = vadd.xlane.f32.xlu0 %v646_v20 }
 0x418   :  { %v3159_v24 = vpop.eup %3158 }
 0x419   :  { %v813_v25 = vsel %vm293_vm3, %v3159_v24, 0.0 }
 0x420   :  { %472 = vrot.lane.b32.xlu1 %v3394_v40, %s3239_s22 }
 0x424   :  { %651 = vrot.lane.b32.xlu1 %v3400_v41, %s3240_s23 }
 0x42c   :  { %305 = vrot.lane.b32.xlu0 %v3394_v40, %s3240_s23 }
 0x448   :  { %814 = vadd.xlane.f32.xlu1 %v813_v25 }
 0x459   :  { %818 = vrot.lane.b32.xlu1 %v3400_v41, %s3239_s22 }
 0x49b   :  { %v302_v26 = vpop.xlane.xlu0 %301 }
 0x49c   :  { %3160 = vrcp.f32 %v302_v26  ;;  %v469_v27 = vpop.xlane.xlu1 %468 }
 0x49d   :  { %3162 = vrcp.f32 %v469_v27 }
 0x4a0   :  { %v473_v31 = vpop.permute.xlu1 %472 }
 0x4a3   :  { %v648_v28 = vpop.xlane.xlu0 %647 }
 0x4a4   :  { %3164 = vrcp.f32 %v648_v28  ;;  %v652_v38 = vpop.permute.xlu1 %651 }
 0x4a6   :  { %v3161_v29 = vpop.eup %3160 }
 0x4a7   :  { %v304_v30 = vmul.f32 %v3161_v29, %v3153_v15  ;;  %v306_v32 = vpop.permute.xlu0 %305  ;;  %v3163_v34 = vpop.eup %3162 }
 0x4a8   :  { %2857 = vmatpush3.msra.mxu1 %v306_v32  ;;  %v471_v37 = vmul.f32 %v3163_v34, %v3155_v16  ;;  %v2673_v34 = vld [vmem:[%s3804_s9] ss:$0 sm:$0xff] }
 0x4a9   :  { %2859 = vmatmul.mubr.msk.f32.vlgmr.msra.gmra.mrb[2].mxu1 %vm293_vm3, %v304_v30  ;;  %2866 = vmatprep.subr.mxu1 %v3234_v36 }
 0x4aa   :  { %2867 = vmatpush3.msra.mxu1 %v473_v31  ;;  %2868 = vmatprep.mubr.msk.f32.mxu1 %vm3235_vm1, %v3234_v36  ;;  %v2672_v31 = vld [vmem:[%s3803_s8] ss:$0 sm:$0xff] }
 0x4ab   :  { %2876 = vmatprep.subr.mxu1 %v3234_v36 }
 0x4ad   :  { %2869 = vmatmul.mubr.msk.f32.vlgmr.msra.gmra.mrb[4].mxu1 %vm293_vm3, %v471_v37 }
 0x4ae   :  { %v3165_v39 = vpop.eup %3164  ;;  %2877 = vmatpush3.msra.mxu1 %v652_v38  ;;  %2878 = vmatprep.mubr.msk.f32.mxu1 %vm3235_vm1, %v3234_v36 }
 0x4af   :  { %v650_v40 = vmul.f32 %v3165_v39, %v3157_v19  ;;  %2886 = vmatprep.subr.mxu1 %v3234_v36  ;;  %v1038_v19 = vld [vmem:[%s3805_s10 + $0x8] sm:$0xff] }
 0x4b1   :  { %2879 = vmatmul.mubr.msk.f32.vlgmr.msra.gmra.mrb[6].mxu1 %vm293_vm3, %v650_v40 }
 0x4b2   :  { %2888 = vmatprep.mubr.msk.f32.mxu1 %vm3235_vm1, %v3234_v36 }
 0x4d5   :  { %v815_v41 = vpop.xlane.xlu1 %814 }
 0x4d6   :  { %3166 = vrcp.f32 %v815_v41 }
 0x4d9   :  { %v819_v42 = vpop.permute.xlu1 %818 }
 0x4da   :  { %2887 = vmatpush3.msra.mxu1 %v819_v42 }
 0x4e0   :  { %v3167_v43 = vpop.eup %3166 }
 0x4e1   :  { %v817_v44 = vmul.f32 %v3167_v43, %v3159_v24  ;;  %v1147_v43 = vld [vmem:[%s3807_s12] sm:$0xff] }
 0x4e3   :  { %2889 = vmatmul.mubr.msk.f32.vlgmr.msra.gmra.mrb[8].mxu1 %vm293_vm3, %v817_v44  ;;  %v1148_v44 = vld [vmem:[%s3807_s12 + $0x8] sm:$0xff] }
 0x4e4   :  { %v3070_v45 = vpack.c.bf16 %v1148_v44, %v1147_v43 }
 0x4e6   :  { %3071 = vmatprep.subr.bf16.mxu0 %v3070_v45 }
 0x57c   :  { %v377_v52 = vpop.f32.mrb[2].mxu1 }
 0x57d   :  { %v2860_v53 = vpop.f32.mrb[3].mxu1 }
 0x57e   :  { %v1153_v53 = vld [vmem:[%s3807_s12 + $0x30] sm:$0xff] }
 0x580   :  { %v544_v54 = vpop.f32.mrb[4].mxu1 }
 0x581   :  { %549 = vrot.lane.b32.xlu0 %v544_v54, %s3241_s1  ;;  %v2870_v55 = vpop.f32.mrb[5].mxu1  ;;  %v1154_v54 = vld [vmem:[%s3807_s12 + $0x38] sm:$0xff] }
 0x582   :  { %v3082_v55 = vpack.c.bf16 %v1154_v54, %v1153_v53  ;;  %v2681_v54 = vld [vmem:[%s3810_s15] ss:$0 sm:$0xff] }
 0x584   :  { %v723_v56 = vpop.f32.mrb[6].mxu1 }
 0x585   :  { %v2880_v57 = vpop.f32.mrb[7].mxu1 }
 0x5b6   :  { %v890_v58 = vpop.f32.mrb[8].mxu1 }
 0x5b7   :  { %895 = vrot.lane.b32.xlu1 %v890_v58, %s3241_s1  ;;  %v2890_v59 = vpop.f32.mrb[9].mxu1 }
 0x5f3   :  { %v550_v61 = vpop.permute.xlu0 %549 }
 0x5f4   :  { %v552_v62 = vsel %vm210_vm2, %v377_v52, %v550_v61  ;;  %v3078_v52 = vpack.c.bf16 %v1152_v51, %v1151_v50  ;;  %v2680_v50 = vld [vmem:[%s3809_s14] ss:$0 sm:$0xff] }
 0x5f5   :  { %2899 = vmatprep.mubr.msk.f32.mxu0 %vm70_vm0, %v552_v62 }
 0x629   :  { %v896_v63 = vpop.permute.xlu1 %895 }
 0x62a   :  { %v898_v0 = vsel %vm210_vm2, %v723_v56, %v896_v63  ;;  %v2674_v56 = vld [vmem:[%s3806_s11] ss:$0 sm:$0xff] }
 0x62b   :  { %2900 = vmatmul.mubr.msk.f32.vlgmr.msra.gmra.mrb[8].mxu0 %vm70_vm0, %v898_v0 }
 0x62c   :  { %3073 = vmatpush3.bf16.msra.mxu0 %v3070_v45 }
 0x62d   :  { %3075 = vmatprep.subr.bf16.mxu0 %v3074_v48 }
 0x630   :  { %3077 = vmatpush3.bf16.msra.mxu0 %v3074_v48 }
 0x631   :  { %3079 = vmatprep.subr.bf16.mxu0 %v3078_v52 }
 0x634   :  { %3081 = vmatpush3.bf16.msra.mxu0 %v3078_v52 }
 0x635   :  { %3083 = vmatprep.subr.bf16.mxu0 %v3082_v55 }
 0x638   :  { %3085 = vmatpush3.bf16.msra.mxu0 %v3082_v55 }
 0x639   :  { %2953 = vmatprep.subr.mxu0 %v3234_v36 }
 0x6fe   :  { %v2901_v2 = vpop.f32.mrb[8].mxu0 }
 0x6ff   :  { %v988_v3 = vadd.f32 %v2901_v2, %v2669_v1  ;;  %v982_v4 = vpop.f32.mrb[9].mxu0 }
 0x700   :  { %v983_v5 = vadd.f32 %v2669_v1, %v982_v4 }
 0x701   :  { %v992_v6 = vadd.f32 %v988_v3, %v3381_v35 }
 0x702   :  { %v991_v7 = vadd.f32 %v983_v5, %v3377_v33  ;;  %v1037_v33 = vld [vmem:[%s3805_s10] sm:$0xff] }
 0x703   :  { %v998_v8 = vsel %vm70_vm0, %v992_v6, 0.0  ;;  %v3062_v20 = vpack.c.bf16 %v1038_v19, %v1037_v33 }
 0x704   :  { %999 = vadd.xlane.f32.xlu1 %v998_v8  ;;  %v995_v9 = vsel %vm70_vm0, %v991_v7, 0.0 }
 0x705   :  { %996 = vadd.xlane.f32.xlu0 %v995_v9  ;;  %3063 = vmatprep.subr.bf16.mxu1 %v3062_v20 }
 0x706   :  { %3065 = vmatpush3.bf16.msra.mxu1 %v3062_v20 }
 0x707   :  { %3067 = vmatprep.subr.bf16.mxu1 %v3066_v23 }
 0x70a   :  { %3069 = vmatpush3.bf16.msra.mxu1 %v3066_v23 }
 0x791   :  { %v1000_v10 = vpop.xlane.xlu1 %999 }
 0x792   :  { %v1002_v11 = vmul.f32 0.03125, %v1000_v10  ;;  %v997_v12 = vpop.xlane.xlu0 %996 }
 0x793   :  { %v1001_v13 = vmul.f32 0.03125, %v997_v12 }
 0x794   :  { %v1004_v14 = vsub.f32 %v992_v6, %v1002_v11 }
 0x795   :  { %v1003_v15 = vsub.f32 %v991_v7, %v1001_v13 }
 0x796   :  { %v1006_v18 = vmul.f32 %v1004_v14, %v1004_v14 }
 0x797   :  { %v1005_v16 = vmul.f32 %v1003_v15, %v1003_v15 }
 0x798   :  { %v1010_v35 = vsel %vm70_vm0, %v1006_v18, 0.0 }
 0x799   :  { %v1007_v17 = vsel %vm70_vm0, %v1005_v16, 0.0  ;;  %v2677_v16 = vld [vmem:[%s3808_s13] ss:$0 sm:$0xff] }
 0x79a   :  { %1008 = vadd.xlane.f32.xlu0 %v1007_v17 }
 0x79e   :  { %1011 = vadd.xlane.f32.xlu0 %v1010_v35 }
 0x827   :  { %v1009_v24 = vpop.xlane.xlu0 %1008 }
 0x828   :  { %v1013_v25 = vmul.f32 0.03125, %v1009_v24 }
 0x82a   :  { %v1015_v26 = vadd.f32 1e-12, %v1013_v25 }
 0x82b   :  { %v1012_v27 = vpop.xlane.xlu0 %1011 }
 0x82c   :  { %3168 = vrsqrt.f32 %v1015_v26  ;;  %v1014_v28 = vmul.f32 0.03125, %v1012_v27 }
 0x82e   :  { %v1016_v29 = vadd.f32 1e-12, %v1014_v28 }
 0x830   :  { %3170 = vrsqrt.f32 %v1016_v29 }
 0x836   :  { %v3169_v30 = vpop.eup %3168 }
 0x837   :  { %v1019_v32 = vmul.f32 %v3169_v30, %v1003_v15 }
 0x839   :  { %v1027_v37 = vmul.f32 %v2672_v31, %v1019_v32 }
 0x83a   :  { %v3171_v38 = vpop.eup %3170 }
 0x83b   :  { %v1020_v39 = vmul.f32 %v3171_v38, %v1004_v14  ;;  %v1035_v40 = vadd.f32 %v2673_v34, %v1027_v37  ;;  %v2683_v37 = vld [vmem:[%s3825_s26 + $0x28] sm:$0xff] }
 0x83d   :  { %v1028_v41 = vmul.f32 %v2672_v31, %v1020_v39  ;;  %2910 = vmatprep.mubr.msk.f32.mxu1 %vm70_vm0, %v1035_v40  ;;  %v2684_v39 = vld [vmem:[%s3825_s26 + $0x30] sm:$0xff] }
 0x83f   :  { %v1036_v42 = vadd.f32 %v2673_v34, %v1028_v41  ;;  %v2682_v34 = vld [vmem:[%s3825_s26 + $0x20] sm:$0xff] }
 0x840   :  { %v3086_v38 = vpack.c.bf16 %v2683_v37, %v2682_v34 }
 0x841   :  { %2911 = vmatmul.mubr.msk.f32.vlgmr.msra.gmra.mrb[10].mxu1 %vm70_vm0, %v1036_v42 }
 0x842   :  { %3087 = vmatprep.subr.bf16.mxu1 %v3086_v38 }
 0x843   :  { %3089 = vmatpush3.bf16.msra.mxu1 %v3086_v38 }
 0x914   :  { %v2912_v57 = vpop.f32.mrb[10].mxu1 }
 0x915   :  { %v1126_v58 = vadd.f32 %v2912_v57, %v2674_v56  ;;  %v1120_v59 = vpop.f32.mrb[11].mxu1 }
 0x916   :  { %v1121_v61 = vadd.f32 %v2674_v56, %v1120_v59  ;;  %v2687_v59 = vld [vmem:[%s3800_s5 + $0x1] ss:$0 sm:$0xff] }
 0x917   :  { %v1130_v62 = vmul.f32 %v1126_v58, %v1126_v58 }
 0x918   :  { %v1129_v63 = vmul.f32 %v1121_v61, %v1121_v61 }
 0x919   :  { %v1132_v0 = vmul.f32 %v1130_v62, %v1126_v58 }
 0x91a   :  { %v1131_v1 = vmul.f32 %v1129_v63, %v1121_v61 }
 0x91b   :  { %v1134_v2 = vmul.f32 0.044715, %v1132_v0 }
 0x91c   :  { %v1133_v3 = vmul.f32 0.044715, %v1131_v1 }
 0x91d   :  { %v1136_v4 = vadd.f32 %v1134_v2, %v1126_v58 }
 0x91e   :  { %v1135_v5 = vadd.f32 %v1133_v3, %v1121_v61 }
 0x91f   :  { %v1138_v6 = vmul.f32 0.7978846, %v1136_v4 }
 0x920   :  { %v1137_v7 = vmul.f32 0.7978846, %v1135_v5 }
 0x921   :  { %3172 = vtanh.f32 %v1138_v6 }
 0x922   :  { %3174 = vtanh.f32 %v1137_v7 }
 0x92b   :  { %v3173_v8 = vpop.eup %3172 }
 0x92c   :  { %v3175_v9 = vpop.eup %3174  ;;  %v1142_v10 = vadd.f32 1.0, %v3173_v8 }
 0x92d   :  { %v1141_v11 = vadd.f32 1.0, %v3175_v9 }
 0x92e   :  { %v1144_v12 = vmul.f32 0.5, %v1142_v10 }
 0x92f   :  { %v1143_v13 = vmul.f32 0.5, %v1141_v11 }
 0x930   :  { %v1146_v15 = vmul.f32 %v1144_v12, %v1126_v58 }
 0x931   :  { %v1145_v14 = vmul.f32 %v1143_v13, %v1121_v61 }
 0x933   :  { %2929 = vmatprep.mubr.msk.f32.mxu0 %vm1162_vm4, %v1145_v14 }
 0x934   :  { %2930 = vmatmul.mubr.msk.f32.vlgmr.msra.gmra.mrb[10].mxu0 %vm1162_vm4, %v1146_v15 }
 0x935   :  { %2955 = vmatprep.mubr.msk.f32.mxu0 %vm3235_vm1, %v3234_v36 }
 0xa07   :  { %v2931_v17 = vpop.f32.mrb[10].mxu0 }
 0xa08   :  { %v1241_v18 = vadd.f32 %v2931_v17, %v2677_v16  ;;  %v1235_v35 = vpop.f32.mrb[11].mxu0 }
 0xa09   :  { %v1236_v33 = vadd.f32 %v2677_v16, %v1235_v35 }
 0xa0a   :  { %v1245_v19 = vadd.f32 %v1241_v18, %v1036_v42 }
 0xa0b   :  { %v1244_v20 = vadd.f32 %v1236_v33, %v1035_v40  ;;  %v2685_v40 = vld [vmem:[%s3825_s26 + $0x38] sm:$0xff] }
 0xa0c   :  { %v1251_v21 = vsel %vm70_vm0, %v1245_v19, 0.0  ;;  %v3090_v41 = vpack.c.bf16 %v2685_v40, %v2684_v39 }
 0xa0d   :  { %1252 = vadd.xlane.f32.xlu1 %v1251_v21  ;;  %v1248_v22 = vsel %vm70_vm0, %v1244_v20, 0.0 }
 0xa0e   :  { %1249 = vadd.xlane.f32.xlu0 %v1248_v22  ;;  %3091 = vmatprep.subr.bf16.mxu1 %v3090_v41 }
 0xa0f   :  { %3093 = vmatpush3.bf16.msra.mxu1 %v3090_v41 }
 0xa10   :  { %2943 = vmatprep.subr.mxu1 %v3234_v36 }
 0xa9a   :  { %v1253_v23 = vpop.xlane.xlu1 %1252 }
 0xa9b   :  { %v1255_v24 = vmul.f32 0.03125, %v1253_v23  ;;  %v1250_v25 = vpop.xlane.xlu0 %1249 }
 0xa9c   :  { %v1254_v26 = vmul.f32 0.03125, %v1250_v25 }
 0xa9d   :  { %v1257_v27 = vsub.f32 %v1245_v19, %v1255_v24 }
 0xa9e   :  { %v1256_v28 = vsub.f32 %v1244_v20, %v1254_v26 }
 0xa9f   :  { %v1259_v29 = vmul.f32 %v1257_v27, %v1257_v27 }
 0xaa0   :  { %v1258_v30 = vmul.f32 %v1256_v28, %v1256_v28 }
 0xaa1   :  { %v1263_v31 = vsel %vm70_vm0, %v1259_v29, 0.0 }
 0xaa2   :  { %1264 = vadd.xlane.f32.xlu1 %v1263_v31  ;;  %v1260_v32 = vsel %vm70_vm0, %v1258_v30, 0.0 }
 0xaa3   :  { %1261 = vadd.xlane.f32.xlu0 %v1260_v32 }
 0xb2f   :  { %v1265_v42 = vpop.xlane.xlu1 %1264 }
 0xb30   :  { %v1267_v43 = vmul.f32 0.03125, %v1265_v42  ;;  %v1262_v44 = vpop.xlane.xlu0 %1261 }
 0xb31   :  { %v1266_v45 = vmul.f32 0.03125, %v1262_v44 }
 0xb32   :  { %v1269_v46 = vadd.f32 1e-12, %v1267_v43 }
 0xb33   :  { %v1268_v47 = vadd.f32 1e-12, %v1266_v45 }
 0xb34   :  { %3176 = vrsqrt.f32 %v1269_v46 }
 0xb35   :  { %3178 = vrsqrt.f32 %v1268_v47 }
 0xb3e   :  { %v3177_v48 = vpop.eup %3176 }
 0xb3f   :  { %v3179_v51 = vpop.eup %3178  ;;  %v1273_v52 = vmul.f32 %v3177_v48, %v1257_v27 }
 0xb40   :  { %v1272_v53 = vmul.f32 %v3179_v51, %v1256_v28 }
 0xb41   :  { %v1281_v55 = vmul.f32 %v2680_v50, %v1273_v52 }
 0xb42   :  { %v1280_v56 = vmul.f32 %v2680_v50, %v1272_v53 }
 0xb43   :  { %v3579_v58 = vadd.f32 %v2681_v54, %v1281_v55 }
 0xb44   :  { %v3577_v57 = vadd.f32 %v2681_v54, %v1280_v56 }
 0xb46   :  { %2940 = vmatprep.mubr.msk.f32.mxu1 %vm70_vm0, %v3577_v57 }
 0xb47   :  { %2941 = vmatmul.mubr.msk.f32.vlgmr.msra.gmra.mrb[12].mxu1 %vm70_vm0, %v3579_v58 }
 0xb48   :  { %2945 = vmatprep.mubr.msk.f32.mxu1 %vm3235_vm1, %v3234_v36 }
 0xc1a   :  { %v2942_v61 = vpop.f32.mrb[12].mxu1 }
 0xc1b   :  { %v1375_v62 = vpop.f32.mrb[13].mxu1  ;;  %v3596_v0 = vadd.f32 %v2942_v61, %v2687_v59 }
 0xc1c   :  { %v3590_v63 = vadd.f32 %v2687_v59, %v1375_v62 }
 0xc1e   :  { %1552 = vrot.lane.b32.xlu1 %v3590_v63, %s3236_s27  ;;  %1385 = vrot.lane.b32.xlu0 %v3590_v63, %s3237_s28 }
 0xc22   :  { %1550 = vrot.lane.b32.xlu1 %v3590_v63, %s3238_s4  ;;  %1890 = vrot.lane.b32.xlu0 %v3596_v0, %s3236_s27 }
 0xc26   :  { %1723 = vrot.lane.b32.xlu1 %v3596_v0, %s3237_s28 }
 0xc2a   :  { %1888 = vrot.lane.b32.xlu1 %v3596_v0, %s3238_s4 }
 0xc90   :  { %v1553_v1 = vpop.permute.xlu1 %1552  ;;  %v1386_v2 = vpop.permute.xlu0 %1385 }
 0xc91   :  { %2944 = vmatpush3.xpose.msk.msra.mxu1 %vm210_vm2, %v1386_v2  ;;  %2954 = vmatpush3.xpose.msk.msra.mxu0 %vm210_vm2, %v1553_v1  ;;  %v2702_v2 = vld [vmem:[%s3801_s6 + $0x20] sm:$0xff] }
 0xc92   :  { %2963 = vmatprep.subr.mxu0 %v3234_v36  ;;  %2948 = vmatprep.subr.mxu1 %v3234_v36 }
 0xc94   :  { %v1551_v3 = vpop.permute.xlu1 %1550  ;;  %2946 = vmatmul.mubr.msk.f32.vlgmr.msra.gmra.mrb[14].mxu1 %vm210_vm2, %v3590_v63  ;;  %v1891_v5 = vpop.permute.xlu0 %1890 }
 0xc95   :  { %2956 = vmatmul.mubr.msk.f32.vlgmr.msra.gmra.mrb[12].mxu0 %vm210_vm2, %v1551_v3  ;;  %2950 = vmatprep.mubr.msk.f32.mxu1 %vm3235_vm1, %v3234_v36  ;;  %v2703_v3 = vld [vmem:[%s3801_s6 + $0x28] sm:$0xff] }
 0xc96   :  { %2965 = vmatprep.mubr.msk.f32.mxu0 %vm3235_vm1, %v3234_v36 }
 0xc98   :  { %v1724_v4 = vpop.permute.xlu1 %1723 }
 0xc99   :  { %2964 = vmatpush3.xpose.msk.msra.mxu0 %vm210_vm2, %v1724_v4  ;;  %v2704_v4 = vld [vmem:[%s3801_s6 + $0x30] sm:$0xff] }
 0xc9a   :  { %2973 = vmatprep.subr.mxu0 %v3234_v36 }
 0xc9c   :  { %2966 = vmatmul.mubr.msk.f32.vlgmr.msra.gmra.mrb[14].mxu0 %vm210_vm2, %v3596_v0  ;;  %v1889_v6 = vpop.permute.xlu1 %1888 }
 0xc9d   :  { %2974 = vmatpush3.xpose.msk.msra.mxu0 %vm210_vm2, %v1891_v5  ;;  %2975 = vmatprep.mubr.msk.f32.mxu0 %vm3235_vm1, %v3234_v36  ;;  %v3094_v5 = vpack.c.bf16 %v2703_v3, %v2702_v2  ;;  %v2725_v2 = vld [vmem:[%s3807_s12 + $0x58] sm:$0xff] }
 0xc9f   :  { %3095 = vmatprep.subr.bf16.mxu0 %v3094_v5 }
 0xca0   :  { %2976 = vmatmul.mubr.msk.f32.vlgmr.msra.gmra.mrb[16].mxu0 %vm210_vm2, %v1889_v6  ;;  %v2705_v6 = vld [vmem:[%s3801_s6 + $0x38] sm:$0xff] }
 0xca1   :  { %3097 = vmatpush3.bf16.msra.mxu0 %v3094_v5  ;;  %v2727_v5 = vld [vmem:[%s3807_s12 + $0x68] sm:$0xff] }
 0xd67   :  { %v1457_v7 = vpop.f32.mrb[14].mxu1 }
 0xd68   :  { %v1461_v8 = vmul.f32 0.25, %v1457_v7  ;;  %v2947_v9 = vpop.f32.mrb[15].mxu1  ;;  %v1624_v10 = vpop.f32.mrb[12].mxu0  ;;  %v3098_v7 = vpack.c.bf16 %v2705_v6, %v2704_v4  ;;  %v2726_v4 = vld [vmem:[%s3807_s12 + $0x60] sm:$0xff] }
 0xd69   :  { %v1628_v11 = vmul.f32 0.25, %v1624_v10  ;;  %v2957_v12 = vpop.f32.mrb[13].mxu0  ;;  %v3118_v6 = vpack.c.bf16 %v2727_v5, %v2726_v4 }
 0xd6a   :  { %v1462_v13 = vadd.f32 %v3432_v49, %v1461_v8  ;;  %3099 = vmatprep.subr.bf16.mxu0 %v3098_v7 }
 0xd6b   :  { %v1629_v14 = vadd.f32 %v3432_v49, %v1628_v11  ;;  %3101 = vmatpush3.bf16.msra.mxu0 %v3098_v7  ;;  %v2728_v7 = vld [vmem:[%s3807_s12 + $0x70] sm:$0xff] }
 0xd6c   :  { %v1463_v15 = vsel %vm293_vm3, %v1462_v13, -inf }
 0xd6d   :  { %1464 = vmax.xlane.f32.xlu0 %v1463_v15  ;;  %v1630_v16 = vsel %vm293_vm3, %v1629_v14, -inf }
 0xd6e   :  { %1631 = vmax.xlane.f32.xlu1 %v1630_v16 }
 0xd6f   :  { %v1795_v17 = vpop.f32.mrb[14].mxu0 }
 0xd70   :  { %v1799_v18 = vmul.f32 0.25, %v1795_v17  ;;  %v2967_v35 = vpop.f32.mrb[15].mxu0 }
 0xd72   :  { %v1800_v33 = vadd.f32 %v3441_v60, %v1799_v18 }
 0xd73   :  { %v1962_v19 = vpop.f32.mrb[16].mxu0 }
 0xd74   :  { %v1966_v20 = vmul.f32 0.25, %v1962_v19  ;;  %v2977_v21 = vpop.f32.mrb[17].mxu0  ;;  %v1801_v22 = vsel %vm293_vm3, %v1800_v33, -inf }
 0xd75   :  { %1802 = vmax.xlane.f32.xlu0 %v1801_v22 }
 0xd76   :  { %v1967_v23 = vadd.f32 %v3441_v60, %v1966_v20 }
 0xd78   :  { %v1968_v49 = vsel %vm293_vm3, %v1967_v23, -inf }
 0xd79   :  { %1969 = vmax.xlane.f32.xlu0 %v1968_v49 }
 0xdfa   :  { %v1465_v24 = vpop.xlane.xlu0 %1464 }
 0xdfb   :  { %v1466_v25 = vsub.f32 %v1462_v13, %v1465_v24  ;;  %v1632_v26 = vpop.xlane.xlu1 %1631 }
 0xdfc   :  { %v1633_v27 = vsub.f32 %v1629_v14, %v1632_v26 }
 0xdfd   :  { %v1467_v28 = vmul.f32 1.442695, %v1466_v25 }
 0xdfe   :  { %v1634_v29 = vmul.f32 1.442695, %v1633_v27 }
 0xdff   :  { %3180 = vpow2.f32 %v1467_v28 }
 0xe00   :  { %3182 = vpow2.f32 %v1634_v29 }
 0xe02   :  { %v1803_v30 = vpop.xlane.xlu0 %1802 }
 0xe03   :  { %v1804_v31 = vsub.f32 %v1800_v33, %v1803_v30  ;;  %v2707_v33 = vld [vmem:[%s3802_s7 + $0x1] ss:$0 sm:$0xff] }
 0xe05   :  { %v1805_v32 = vmul.f32 1.442695, %v1804_v31 }
 0xe06   :  { %v1970_v41 = vpop.xlane.xlu0 %1969 }
 0xe07   :  { %3184 = vpow2.f32 %v1805_v32  ;;  %v1971_v42 = vsub.f32 %v1967_v23, %v1970_v41 }
 0xe09   :  { %v3181_v34 = vpop.eup %3180  ;;  %v1972_v43 = vmul.f32 1.442695, %v1971_v42 }
 0xe0a   :  { %v3183_v37 = vpop.eup %3182  ;;  %v1469_v38 = vsel %vm293_vm3, %v3181_v34, 0.0 }
 0xe0b   :  { %1470 = vadd.xlane.f32.xlu0 %v1469_v38  ;;  %v1636_v60 = vsel %vm293_vm3, %v3183_v37, 0.0  ;;  %3186 = vpow2.f32 %v1972_v43  ;;  %v2715_v38 = vld [vmem:[%s3805_s10 + $0x28] sm:$0xff] }
 0xe0c   :  { %1637 = vadd.xlane.f32.xlu1 %v1636_v60 }
 0xe11   :  { %v3185_v39 = vpop.eup %3184 }
 0xe12   :  { %v1807_v40 = vsel %vm293_vm3, %v3185_v39, 0.0 }
 0xe13   :  { %1808 = vadd.xlane.f32.xlu0 %v1807_v40  ;;  %v2717_v40 = vld [vmem:[%s3805_s10 + $0x38] sm:$0xff] }
 0xe15   :  { %v3187_v44 = vpop.eup %3186 }
 0xe16   :  { %v1974_v45 = vsel %vm293_vm3, %v3187_v44, 0.0 }
 0xe1d   :  { %1641 = vrot.lane.b32.xlu1 %v3590_v63, %s3239_s22 }
 0xe21   :  { %1812 = vrot.lane.b32.xlu1 %v3596_v0, %s3240_s23 }
 0xe29   :  { %1474 = vrot.lane.b32.xlu0 %v3590_v63, %s3240_s23 }
 0xe45   :  { %1975 = vadd.xlane.f32.xlu1 %v1974_v45 }
 0xe56   :  { %1979 = vrot.lane.b32.xlu1 %v3596_v0, %s3239_s22 }
 0xe98   :  { %v1471_v46 = vpop.xlane.xlu0 %1470 }
 0xe99   :  { %3188 = vrcp.f32 %v1471_v46  ;;  %v1638_v47 = vpop.xlane.xlu1 %1637 }
 0xe9a   :  { %3190 = vrcp.f32 %v1638_v47 }
 0xe9d   :  { %v1642_v52 = vpop.permute.xlu1 %1641 }
 0xea0   :  { %v1809_v48 = vpop.xlane.xlu0 %1808 }
 0xea1   :  { %3192 = vrcp.f32 %v1809_v48  ;;  %v1813_v56 = vpop.permute.xlu1 %1812 }
 0xea3   :  { %v3189_v50 = vpop.eup %3188 }
 0xea4   :  { %v1473_v51 = vmul.f32 %v3189_v50, %v3181_v34  ;;  %v1475_v53 = vpop.permute.xlu0 %1474  ;;  %v3191_v54 = vpop.eup %3190  ;;  %v2712_v50 = vld [vmem:[%s3803_s8 + $0x1] ss:$0 sm:$0xff] }
 0xea5   :  { %2949 = vmatpush3.msra.mxu1 %v1475_v53  ;;  %v1640_v55 = vmul.f32 %v3191_v54, %v3183_v37 }
 0xea6   :  { %2951 = vmatmul.mubr.msk.f32.vlgmr.msra.gmra.mrb[16].mxu1 %vm293_vm3, %v1473_v51  ;;  %2958 = vmatprep.subr.mxu1 %v3234_v36 }
 0xea7   :  { %2959 = vmatpush3.msra.mxu1 %v1642_v52  ;;  %2960 = vmatprep.mubr.msk.f32.mxu1 %vm3235_vm1, %v3234_v36  ;;  %v2713_v52 = vld [vmem:[%s3804_s9 + $0x1] ss:$0 sm:$0xff] }
 0xea8   :  { %2968 = vmatprep.subr.mxu1 %v3234_v36 }
 0xeaa   :  { %2961 = vmatmul.mubr.msk.f32.vlgmr.msra.gmra.mrb[18].mxu1 %vm293_vm3, %v1640_v55 }
 0xeab   :  { %v3193_v59 = vpop.eup %3192  ;;  %2969 = vmatpush3.msra.mxu1 %v1813_v56  ;;  %2970 = vmatprep.mubr.msk.f32.mxu1 %vm3235_vm1, %v3234_v36 }
 0xeac   :  { %v1811_v61 = vmul.f32 %v3193_v59, %v3185_v39  ;;  %2978 = vmatprep.subr.mxu1 %v3234_v36  ;;  %v2716_v39 = vld [vmem:[%s3805_s10 + $0x30] sm:$0xff] }
 0xead   :  { %v3106_v41 = vpack.c.bf16 %v2717_v40, %v2716_v39 }
 0xeae   :  { %2971 = vmatmul.mubr.msk.f32.vlgmr.msra.gmra.mrb[20].mxu1 %vm293_vm3, %v1811_v61 }
 0xeaf   :  { %2980 = vmatprep.mubr.msk.f32.mxu1 %vm3235_vm1, %v3234_v36 }
 0xed2   :  { %v1976_v62 = vpop.xlane.xlu1 %1975 }
 0xed3   :  { %3194 = vrcp.f32 %v1976_v62  ;;  %v2722_v62 = vld [vmem:[%s3807_s12 + $0x40] sm:$0xff] }
 0xed6   :  { %v1980_v63 = vpop.permute.xlu1 %1979 }
 0xed7   :  { %2979 = vmatpush3.msra.mxu1 %v1980_v63  ;;  %v2723_v63 = vld [vmem:[%s3807_s12 + $0x48] sm:$0xff] }
 0xedd   :  { %v3195_v0 = vpop.eup %3194 }
 0xede   :  { %v1978_v1 = vmul.f32 %v3195_v0, %v3187_v44  ;;  %v3110_v0 = vpack.c.bf16 %v2723_v63, %v2722_v62 }
 0xee0   :  { %2981 = vmatmul.mubr.msk.f32.vlgmr.msra.gmra.mrb[22].mxu1 %vm293_vm3, %v1978_v1  ;;  %3111 = vmatprep.subr.bf16.mxu0 %v3110_v0  ;;  %v2724_v1 = vld [vmem:[%s3807_s12 + $0x50] sm:$0xff] }
 0xee1   :  { %v3114_v3 = vpack.c.bf16 %v2725_v2, %v2724_v1 }
 0xf79   :  { %v1546_v8 = vpop.f32.mrb[16].mxu1 }
 0xf7a   :  { %v2952_v9 = vpop.f32.mrb[17].mxu1 }
 0xf7d   :  { %v1713_v10 = vpop.f32.mrb[18].mxu1 }
 0xf7e   :  { %1718 = vrot.lane.b32.xlu0 %v1713_v10, %s3241_s1  ;;  %v2962_v11 = vpop.f32.mrb[19].mxu1  ;;  %v2719_v10 = vld [vmem:[%s3806_s11 + $0x1] ss:$0 sm:$0xff] }
 0xf81   :  { %v1884_v12 = vpop.f32.mrb[20].mxu1 }
 0xf82   :  { %v2972_v13 = vpop.f32.mrb[21].mxu1 }
 0xfb3   :  { %v2051_v14 = vpop.f32.mrb[22].mxu1 }
 0xfb4   :  { %2056 = vrot.lane.b32.xlu1 %v2051_v14, %s3241_s1  ;;  %v2982_v15 = vpop.f32.mrb[23].mxu1 }
 0xff0   :  { %v1719_v16 = vpop.permute.xlu0 %1718 }
 0xff1   :  { %v1721_v17 = vsel %vm210_vm2, %v1546_v8, %v1719_v16  ;;  %v2729_v8 = vld [vmem:[%s3807_s12 + $0x78] sm:$0xff] }
 0xff2   :  { %2991 = vmatprep.mubr.msk.f32.mxu0 %vm70_vm0, %v1721_v17  ;;  %v3122_v9 = vpack.c.bf16 %v2729_v8, %v2728_v7  ;;  %v2737_v7 = vld [vmem:[%s3810_s15 + $0x1] ss:$0 sm:$0xff] }
0x1026   :  { %v2057_v18 = vpop.permute.xlu1 %2056 }
0x1027   :  { %v2059_v35 = vsel %vm210_vm2, %v1884_v12, %v2057_v18 }
0x1028   :  { %2992 = vmatmul.mubr.msk.f32.vlgmr.msra.gmra.mrb[18].mxu0 %vm70_vm0, %v2059_v35 }
0x1029   :  { %3113 = vmatpush3.bf16.msra.mxu0 %v3110_v0 }
0x102a   :  { %3115 = vmatprep.subr.bf16.mxu0 %v3114_v3 }
0x102d   :  { %3117 = vmatpush3.bf16.msra.mxu0 %v3114_v3  ;;  %v2736_v3 = vld [vmem:[%s3809_s14 + $0x1] ss:$0 sm:$0xff] }
0x102e   :  { %3119 = vmatprep.subr.bf16.mxu0 %v3118_v6 }
0x1031   :  { %3121 = vmatpush3.bf16.msra.mxu0 %v3118_v6 }
0x1032   :  { %3123 = vmatprep.subr.bf16.mxu0 %v3122_v9 }
0x1035   :  { %3125 = vmatpush3.bf16.msra.mxu0 %v3122_v9 }
0x10fb   :  { %v2993_v19 = vpop.f32.mrb[18].mxu0 }
0x10fc   :  { %v2151_v20 = vadd.f32 %v2993_v19, %v2707_v33  ;;  %v2145_v21 = vpop.f32.mrb[19].mxu0 }
0x10fd   :  { %v2146_v22 = vadd.f32 %v2707_v33, %v2145_v21 }
0x10fe   :  { %v2155_v23 = vadd.f32 %v2151_v20, %v3579_v58 }
0x10ff   :  { %v2154_v49 = vadd.f32 %v2146_v22, %v3577_v57  ;;  %v2714_v57 = vld [vmem:[%s3805_s10 + $0x20] sm:$0xff] }
0x1100   :  { %v2163_v24 = vsel %vm70_vm0, %v2155_v23, 0.0  ;;  %v3102_v60 = vpack.c.bf16 %v2715_v38, %v2714_v57 }
0x1101   :  { %2164 = vadd.xlane.f32.xlu1 %v2163_v24  ;;  %v2160_v25 = vsel %vm70_vm0, %v2154_v49, 0.0 }
0x1102   :  { %2161 = vadd.xlane.f32.xlu0 %v2160_v25  ;;  %3103 = vmatprep.subr.bf16.mxu1 %v3102_v60 }
0x1103   :  { %3105 = vmatpush3.bf16.msra.mxu1 %v3102_v60 }
0x1104   :  { %3107 = vmatprep.subr.bf16.mxu1 %v3106_v41 }
0x1107   :  { %3109 = vmatpush3.bf16.msra.mxu1 %v3106_v41 }
0x118e   :  { %v2165_v26 = vpop.xlane.xlu1 %2164 }
0x118f   :  { %v2167_v27 = vmul.f32 0.03125, %v2165_v26  ;;  %v2162_v28 = vpop.xlane.xlu0 %2161 }
0x1190   :  { %v2166_v29 = vmul.f32 0.03125, %v2162_v28 }
0x1191   :  { %v2169_v30 = vsub.f32 %v2155_v23, %v2167_v27 }
0x1192   :  { %v2168_v31 = vsub.f32 %v2154_v49, %v2166_v29 }
0x1193   :  { %v2171_v37 = vmul.f32 %v2169_v30, %v2169_v30 }
0x1194   :  { %v2170_v32 = vmul.f32 %v2168_v31, %v2168_v31 }
0x1195   :  { %v2175_v58 = vsel %vm70_vm0, %v2171_v37, 0.0 }
0x1196   :  { %v2172_v34 = vsel %vm70_vm0, %v2170_v32, 0.0 }
0x1197   :  { %2173 = vadd.xlane.f32.xlu0 %v2172_v34 }
0x119b   :  { %2176 = vadd.xlane.f32.xlu0 %v2175_v58 }
0x1224   :  { %v2174_v42 = vpop.xlane.xlu0 %2173 }
0x1225   :  { %v2178_v43 = vmul.f32 0.03125, %v2174_v42 }
0x1227   :  { %v2180_v44 = vadd.f32 1e-12, %v2178_v43 }
0x1228   :  { %v2177_v45 = vpop.xlane.xlu0 %2176 }
0x1229   :  { %3196 = vrsqrt.f32 %v2180_v44  ;;  %v2179_v46 = vmul.f32 0.03125, %v2177_v45 }
0x122b   :  { %v2181_v47 = vadd.f32 1e-12, %v2179_v46 }
0x122d   :  { %3198 = vrsqrt.f32 %v2181_v47 }
0x1233   :  { %v3197_v48 = vpop.eup %3196 }
0x1234   :  { %v2184_v51 = vmul.f32 %v3197_v48, %v2168_v31 }
0x1236   :  { %v2192_v53 = vmul.f32 %v2712_v50, %v2184_v51  ;;  %v2466_v51 = vld [vmem:[%s3811_s16 + $0x8] sm:$0xff] }
0x1237   :  { %v3199_v54 = vpop.eup %3198 }
0x1238   :  { %v2185_v55 = vmul.f32 %v3199_v54, %v2169_v30  ;;  %v2200_v56 = vadd.f32 %v2713_v52, %v2192_v53  ;;  %v2731_v30 = vld [vmem:[%s3808_s13 + $0x1] ss:$0 sm:$0xff]  ;;  %v2467_v53 = vld [vmem:[%s3811_s16 + $0x10] sm:$0xff]  ;;  %v2468_v54 = vld [vmem:[%s3811_s16 + $0x18] sm:$0xff] }
0x123a   :  { %v2193_v59 = vmul.f32 %v2712_v50, %v2185_v55  ;;  %3002 = vmatprep.mubr.msk.f32.mxu1 %vm70_vm0, %v2200_v56  ;;  %v2465_v50 = vld [vmem:[%s3811_s16] sm:$0xff]  ;;  %v3242_v55 = vmov 0.0|0.0  }
0x123b   :  { %3126 = vmatprep.subr.bf16.mxu1 %v3242_v55 }
0x123c   :  { %v2201_v61 = vadd.f32 %v2713_v52, %v2193_v59  ;;  %v3127_v52 = vpack.c.bf16 %v2466_v51, %v2465_v50 }
0x123e   :  { %3003 = vmatmul.mubr.msk.f32.vlgmr.msra.gmra.mrb[24].mxu1 %vm70_vm0, %v2201_v61 }
0x123f   :  { %3032 = vmatprep.mubr.msk.f32.mxu1 %vm3235_vm1, %v3234_v36  ;;  %3128 = vmatpush3.bf16.msra.mxu1 %v3127_v52 }
0x1240   :  { %3129 = vmatprep.subr.bf16.mxu1 %v3242_v55 }
0x1311   :  { %v3004_v11 = vpop.f32.mrb[24].mxu1 }
0x1312   :  { %v2293_v12 = vadd.f32 %v3004_v11, %v2719_v10  ;;  %v2287_v13 = vpop.f32.mrb[25].mxu1 }
0x1313   :  { %v2288_v14 = vadd.f32 %v2719_v10, %v2287_v13 }
0x1314   :  { %v2297_v15 = vmul.f32 %v2293_v12, %v2293_v12 }
0x1315   :  { %v2296_v16 = vmul.f32 %v2288_v14, %v2288_v14 }
0x1316   :  { %v2299_v17 = vmul.f32 %v2297_v15, %v2293_v12  ;;  %v2551_v15 = vld [vmem:[%s3813_s18 + $0x8] sm:$0xff] }
0x1317   :  { %v2298_v18 = vmul.f32 %v2296_v16, %v2288_v14  ;;  %v2552_v16 = vld [vmem:[%s3813_s18 + $0x10] sm:$0xff] }
0x1318   :  { %v2301_v35 = vmul.f32 0.044715, %v2299_v17 }
0x1319   :  { %v2300_v33 = vmul.f32 0.044715, %v2298_v18  ;;  %v2553_v18 = vld [vmem:[%s3813_s18 + $0x18] sm:$0xff] }
0x131a   :  { %v2303_v19 = vadd.f32 %v2301_v35, %v2293_v12  ;;  %v3136_v35 = vpack.c.bf16 %v2553_v18, %v2552_v16 }
0x131b   :  { %v2302_v20 = vadd.f32 %v2300_v33, %v2288_v14 }
0x131c   :  { %v2305_v21 = vmul.f32 0.7978846, %v2303_v19 }
0x131d   :  { %v2304_v22 = vmul.f32 0.7978846, %v2302_v20 }
0x131e   :  { %3200 = vtanh.f32 %v2305_v21 }
0x131f   :  { %3202 = vtanh.f32 %v2304_v22  ;;  %v2740_v22 = vld [vmem:[%s3814_s19] ss:$0 sm:$0xff] }
0x1328   :  { %v3201_v23 = vpop.eup %3200 }
0x1329   :  { %v3203_v49 = vpop.eup %3202  ;;  %v2309_v24 = vadd.f32 1.0, %v3201_v23 }
0x132a   :  { %v2308_v25 = vadd.f32 1.0, %v3203_v49 }
0x132b   :  { %v2311_v26 = vmul.f32 0.5, %v2309_v24 }
0x132c   :  { %v2310_v27 = vmul.f32 0.5, %v2308_v25 }
0x132d   :  { %v2313_v29 = vmul.f32 %v2311_v26, %v2293_v12 }
0x132e   :  { %v2312_v28 = vmul.f32 %v2310_v27, %v2288_v14  ;;  %v2550_v14 = vld [vmem:[%s3813_s18] sm:$0xff]  ;;  %s3243_s18 = smov [#allocation2]  }
0x132f   :  { %v3133_v17 = vpack.c.bf16 %v2551_v15, %v2550_v14  ;;  %s2641_s5 = sshll.u32 %s3243_s18, 4  ;;  %s2642_s5 = int_to_ptr.vmem [resolvable:$true] %s2641_s5 }
0x1330   :  { %3021 = vmatprep.mubr.msk.f32.mxu0 %vm1162_vm4, %v2312_v28  ;;  %s3210_s11 = scalar_lea.vmem %s2642_s5, 32  ;;  %p3215_p1 = scmp.lt.s32.totalorder %s2642_s5, %s2642_s5 }
0x1331   :  { %3022 = vmatmul.mubr.msk.f32.vlgmr.msra.gmra.mrb[20].mxu0 %vm1162_vm4, %v2313_v29  ;;  %p3211_p0 = scmp.ne.s32.totalorder %s2642_s5, %s3210_s11  ;;  %p3216_p2 = scmp.lt.s32.totalorder %s3210_s11, %s3210_s11 }
0x1333   :  { %p3217_p3 = por %p3216_p2, %p3215_p1 }
0x1335   :  { %p3218_p4 = pnand %p3217_p3, %p3211_p0 }
0x1404   :  { %v3023_v31 = vpop.f32.mrb[20].mxu0 }
0x1405   :  { %v2409_v32 = vadd.f32 %v3023_v31, %v2731_v30  ;;  %v2403_v34 = vpop.f32.mrb[21].mxu0 }
0x1406   :  { %v2404_v37 = vadd.f32 %v2731_v30, %v2403_v34 }
0x1407   :  { %v2413_v58 = vadd.f32 %v2409_v32, %v2201_v61 }
0x1408   :  { %v2412_v57 = vadd.f32 %v2404_v37, %v2200_v56  ;;  %v3130_v56 = vpack.c.bf16 %v2468_v54, %v2467_v53 }
0x1409   :  { %v2421_v38 = vsel %vm70_vm0, %v2413_v58, 0.0 }
0x140a   :  { %2422 = vadd.xlane.f32.xlu0 %v2421_v38  ;;  %v2418_v60 = vsel %vm70_vm0, %v2412_v57, 0.0  ;;  %3131 = vmatpush3.bf16.msra.mxu1 %v3130_v56 }
0x140b   :  { %2419 = vadd.xlane.f32.xlu1 %v2418_v60  ;;  %3132 = vmatprep.subr.bf16.mxu1 %v3242_v55 }
0x1497   :  { %v2423_v39 = vpop.xlane.xlu0 %2422 }
0x1498   :  { %v2425_v40 = vmul.f32 0.03125, %v2423_v39  ;;  %v2420_v41 = vpop.xlane.xlu1 %2419 }
0x1499   :  { %v2424_v42 = vmul.f32 0.03125, %v2420_v41 }
0x149a   :  { %v2427_v43 = vsub.f32 %v2413_v58, %v2425_v40 }
0x149b   :  { %v2426_v44 = vsub.f32 %v2412_v57, %v2424_v42 }
0x149c   :  { %v2429_v45 = vmul.f32 %v2427_v43, %v2427_v43 }
0x149d   :  { %v2428_v46 = vmul.f32 %v2426_v44, %v2426_v44 }
0x149e   :  { %v2433_v47 = vsel %vm70_vm0, %v2429_v45, 0.0 }
0x149f   :  { %2434 = vadd.xlane.f32.xlu0 %v2433_v47  ;;  %v2430_v48 = vsel %vm70_vm0, %v2428_v46, 0.0 }
0x14a0   :  { %2431 = vadd.xlane.f32.xlu1 %v2430_v48 }
0x152c   :  { %v2435_v59 = vpop.xlane.xlu0 %2434 }
0x152d   :  { %v2437_v61 = vmul.f32 0.03125, %v2435_v59  ;;  %v2432_v62 = vpop.xlane.xlu1 %2431 }
0x152e   :  { %v2436_v63 = vmul.f32 0.03125, %v2432_v62 }
0x152f   :  { %v2439_v0 = vadd.f32 1e-12, %v2437_v61 }
0x1530   :  { %v2438_v1 = vadd.f32 1e-12, %v2436_v63 }
0x1531   :  { %3204 = vrsqrt.f32 %v2439_v0 }
0x1532   :  { %3206 = vrsqrt.f32 %v2438_v1 }
0x153b   :  { %v3205_v2 = vpop.eup %3204 }
0x153c   :  { %v3207_v4 = vpop.eup %3206  ;;  %v2443_v5 = vmul.f32 %v3205_v2, %v2427_v43 }
0x153d   :  { %v2442_v6 = vmul.f32 %v3207_v4, %v2426_v44 }
0x153e   :  { %v2451_v8 = vmul.f32 %v2736_v3, %v2443_v5 }
0x153f   :  { %v2450_v9 = vmul.f32 %v2736_v3, %v2442_v6 }
0x1540   :  { %v2459_v10 = vadd.f32 %v2737_v7, %v2451_v8 }
0x1541   :  { %v2458_v11 = vadd.f32 %v2737_v7, %v2450_v9 }
0x1542   :  { %v2461_v12 = vrot.slane %v2459_v10, 7 }
0x1544   :  { %v2464_v13 = vsel %vm2463_vm5, %v2458_v11, %v2461_v12 }
0x1545   :  { %3033 = vmatmul.mubr.msk.f32.vlgmr.msra.gmra.mrb[26].mxu1 %vm70_vm0, %v2464_v13 }
0x1546   :  { %3043 = vmatprep.mubr.msk.f32.mxu1 %vm3235_vm1, %v3234_v36  ;;  %3134 = vmatpush3.bf16.msra.mxu1 %v3133_v17  ;;  %v2738_v36 = vld [vmem:[%s3812_s17] ss:$0 sm:$0xff] }
0x1547   :  { %3135 = vmatprep.subr.bf16.mxu1 %v3242_v55 }
0x154a   :  { %3137 = vmatpush3.bf16.msra.mxu1 %v3136_v35 }
0x1618   :  { %v2545_v33 = vpop.f32.mrb[26].mxu1 }
0x1619   :  { %v2546_v19 = vadd.f32 %v2738_v36, %v2545_v33  ;;  %v3034_v20 = vpop.f32.mrb[27].mxu1 }
0x161b   :  { %3208 = vtanh.f32 %v2546_v19 }
0x1625   :  { %v3209_v21 = vpop.eup %3208 }
0x1626   :  { %3044 = vmatmul.mubr.msk.f32.vlgmr.msra.gmra.mrb[28].mxu1 %vm70_vm0, %v3209_v21 }
0x16f9   :  { %v2630_v23 = vpop.f32.mrb[28].mxu1 }
0x16fa   :  { %v2631_v49 = vadd.f32 %v2740_v22, %v2630_v23  ;;  %v3045_v24 = vpop.f32.mrb[29].mxu1 }
0x16fc   :  { %2634 = vst [vmem:[#allocation2] sm:$0x3] %v2631_v49 }
0x16fd   :  { %3221 = shalt.err (!%p3218_p4)
}
0x16fe   :  { %s3222_s13 = scalar_lea.hbm %s3815_s20, 32 }
0x16ff   :  { %p3223_p5 = scmp.ne.s32.totalorder %s3815_s20, %s3222_s13  ;;  %p3226_p6 = scmp.lt.u32.totalorder %s3222_s13, %s3815_s20 }
0x1701   :  { %p3228_p7 = pnand %p3226_p6, %p3223_p5 }
0x1703   :  { %3231 = shalt.err (!%p3228_p7)
}
0x1704   :  { %2644 = dma.vmem_to_hbm [thread:$0]  %s2642_s5, 32, %s3815_s20, [#allocation3]  }
0x1705   :  { %3232 = dma.done.wait [#allocation3], 32  }
0x1706   :  { %3233 = vsyncadd [#allocation3], 4294967264 }
0x1707   :  { %2648 = vsyncpa [#allocation3], 1 }

</bundles_post_ra>
